<compile_context>
chip_gen: v5e
topology: v5e:2x2
jax: 0.10.0
libtpu: 0.0.40
codegen_flags: <defaults>
</compile_context>

<pallas_src>
import functools

import jax
import jax.numpy as jnp
import numpy as np
from jax import lax
from jax.experimental import pallas as pl
from jax.experimental.pallas import tpu as pltpu


def _round_up(x, m):
    return (x + m - 1) // m * m


def _pick_divisor_tile(n, target, align):
    """Largest multiple of `align` that divides n and is <= target, else None."""
    if n % align != 0:
        return None
    cand = min(target, n)
    cand -= cand % align
    while cand >= align:
        if n % cand == 0:
            return cand
        cand -= align
    return None


_VMEM_LIMIT_CACHE = None


def _vmem_limit():
    """Per-generation VMEM budget: ~3/4 of physical, capped (v7x has 64 MiB)."""
    global _VMEM_LIMIT_CACHE
    if _VMEM_LIMIT_CACHE is None:
        try:
            cap = pltpu.get_tpu_info().vmem_capacity_bytes
            _VMEM_LIMIT_CACHE = max(min(cap * 3 // 4, 96 * 1024 * 1024),
                                    32 * 1024 * 1024)
        except Exception:  # conservative fallback that fits every generation
            _VMEM_LIMIT_CACHE = 48 * 1024 * 1024
    return int(_VMEM_LIMIT_CACHE)


# ----------------------------------------------------------------------------
# Tiled dense kernel: y = x @ w_t + b.  bf16 MXU operands, f32 accumulation.
# grid = (M tiles, N tiles, K tiles); K is the reduction ("arbitrary") axis.
# ----------------------------------------------------------------------------
def _linear_kernel(x_ref, wt_ref, b_ref, o_ref, acc_ref):
    @pl.when(pl.program_id(2) == 0)
    def _():
        acc_ref[...] = jnp.zeros_like(acc_ref)

    acc_ref[...] += jnp.dot(x_ref[...], wt_ref[...],
                            preferred_element_type=jnp.float32)

    @pl.when(pl.program_id(2) == pl.num_programs(2) - 1)
    def _():
        o_ref[...] = (acc_ref[...] + b_ref[...]).astype(o_ref.dtype)


def linear_pallas(x, w_t, b, *, out_dtype=jnp.float32,
                  block_m=512, block_n=512, block_k=1024):
    """x: (M, K), w_t: (K, N), b: (1, N) -> (M, N) in out_dtype.

    Tile sizes are chosen to DIVIDE M/N/K so no activation padding copy is
    needed (callers pad the weights once instead: M % 8 == 0, N % 128 == 0).
    """
    M, K = x.shape
    N = w_t.shape[1]
    x = x.astype(jnp.bfloat16)
    w_t = w_t.astype(jnp.bfloat16)
    b = b.astype(jnp.float32)

    bm = _pick_divisor_tile(M, block_m, 8)
    bn = _pick_divisor_tile(N, block_n, 128)
    bk = _pick_divisor_tile(K, block_k, 128)
    assert bm is not None and bn is not None, (M, N)
    if bk is None:          # K not a multiple of 128 (e.g. small embed dim)
        bk = K              # full-K block is always legal

    return pl.pallas_call(
        _linear_kernel,
        out_shape=jax.ShapeDtypeStruct((M, N), out_dtype),
        grid_spec=pltpu.PrefetchScalarGridSpec(
            num_scalar_prefetch=0,
            grid=(M // bm, N // bn, K // bk),
            in_specs=[
                pl.BlockSpec((bm, bk), lambda i, j, k: (i, k)),
                pl.BlockSpec((bk, bn), lambda i, j, k: (k, j)),
                pl.BlockSpec((1, bn), lambda i, j, k: (0, j)),
            ],
            out_specs=pl.BlockSpec((bm, bn), lambda i, j, k: (i, j)),
            scratch_shapes=[pltpu.VMEM((bm, bn), jnp.float32)],
        ),
        compiler_params=pltpu.CompilerParams(
            dimension_semantics=("parallel", "parallel", "arbitrary"),
            vmem_limit_bytes=_vmem_limit()),
    )(x, w_t, b)


# ----------------------------------------------------------------------------
# Streamed LSTM recurrence: 1-D grid over time chunks of Tc steps.
#   gx_ref : (Tc, Bp, 4Hp) bf16  precomputed x @ W_ih + b for this chunk
#   whh_ref: (Hp, 4Hp)     bf16  recurrent weights (same block every step)
#   hs_ref : (Tc, Bp, Hp)  bf16  hidden states for this chunk
#   h_scr (bf16) / c_scr (f32): (Bp, Hp) — carried across grid iterations.
# ----------------------------------------------------------------------------
def _lstm_chunk_kernel(gx_ref, whh_ref, hs_ref, h_scr, c_scr, *, tc, unroll):
    Hp = whh_ref.shape[0]

    @pl.when(pl.program_id(0) == 0)
    def _():
        h_scr[...] = jnp.zeros_like(h_scr)
        c_scr[...] = jnp.zeros_like(c_scr)

    whh = whh_ref[...]

    def step(t, carry):
        h, c = carry
        # only the (Bp,Hp) x (Hp,4Hp) matmul is on the serial chain
        gates = gx_ref[t].astype(jnp.float32) + jnp.dot(
            h, whh, preferred_element_type=jnp.float32)
        # Hp is a multiple of 128 -> every gate slice is lane-aligned
        i_g = jax.nn.sigmoid(gates[:, 0 * Hp:1 * Hp])
        f_g = jax.nn.sigmoid(gates[:, 1 * Hp:2 * Hp])
        g_g = jnp.tanh(gates[:, 2 * Hp:3 * Hp])
        o_g = jax.nn.sigmoid(gates[:, 3 * Hp:4 * Hp])
        c_new = f_g * c + i_g * g_g
        h_new = o_g * jnp.tanh(c_new)
        h_bf = h_new.astype(jnp.bfloat16)
        hs_ref[t] = h_bf
        return h_bf, c_new

    h_fin, c_fin = lax.fori_loop(0, tc, step, (h_scr[...], c_scr[...]),
                                 unroll=unroll)
    h_scr[...] = h_fin
    c_scr[...] = c_fin


def lstm_recurrence(gx_tbg, w_hh_p, *, time_chunk):
    # TODO(synk): on v7x, add a leading "parallel" grid axis splitting Bp
    # across the two TensorCores (each half-batch recurrence is independent).
    Tp, Bp, G = gx_tbg.shape
    Hp = w_hh_p.shape[0]
    assert Tp % time_chunk == 0
    unroll = True if time_chunk <= 16 else 8
    kernel = functools.partial(_lstm_chunk_kernel, tc=time_chunk, unroll=unroll)
    return pl.pallas_call(
        kernel,
        out_shape=jax.ShapeDtypeStruct((Tp, Bp, Hp), jnp.bfloat16),
        grid_spec=pltpu.PrefetchScalarGridSpec(
            num_scalar_prefetch=0,
            grid=(Tp // time_chunk,),
            in_specs=[
                pl.BlockSpec((time_chunk, Bp, G), lambda i: (i, 0, 0)),
                pl.BlockSpec((Hp, G), lambda i: (0, 0)),
            ],
            out_specs=pl.BlockSpec((time_chunk, Bp, Hp), lambda i: (i, 0, 0)),
            scratch_shapes=[pltpu.VMEM((Bp, Hp), jnp.bfloat16),
                            pltpu.VMEM((Bp, Hp), jnp.float32)],
        ),
        compiler_params=pltpu.CompilerParams(
            dimension_semantics=("arbitrary",),
            vmem_limit_bytes=_vmem_limit()),
    )(gx_tbg, w_hh_p.astype(jnp.bfloat16))


# ----------------------------------------------------------------------------
# Parameter padding helpers (lane/sublane alignment; pads are mathematically
# inert: padded h/c lanes stay exactly 0 through the recurrence)
# ----------------------------------------------------------------------------
def _pad_gates_last(w, H, Hp):
    """Pad the trailing 4H gate axis to 4Hp, per gate (order i, f, g, o)."""
    lead = w.shape[:-1]
    w4 = w.reshape(lead + (4, H))
    pad = [(0, 0)] * (len(lead) + 1) + [(0, Hp - H)]
    return jnp.pad(w4, pad).reshape(lead + (4 * Hp,))


# ----------------------------------------------------------------------------
# Full forward pass (mirrors RNN_LSTM_embed_twin.forward, reverse=False)
# ----------------------------------------------------------------------------
@functools.partial(jax.jit, static_argnames=("time_chunk",))
def rnn_lstm_embed_twin_forward(x_tokens, params, time_chunk=None):
    """
    x_tokens: (B, T) int32 token ids in [0, num_classes)
    returns: (out, states)
      out:    (B, T, num_classes)
      states: (T, B, hidden_size)   # matches the PyTorch stack(outputs, 1) quirk
    """
    B, T = x_tokens.shape
    embed_w = params["embed_w"]
    E = embed_w.shape[1]
    H = params["w_hh_t"].shape[0]
    C = params["w_fc_t"].shape[1]

    Bp = _round_up(B, 8)       # sublanes
    Hp = _round_up(H, 128)     # lanes
    Cp = _round_up(C, 128)

    # TODO(synk): size time_chunk per generation (v5e/v6e: 64-128, v7x: ~32).
    if time_chunk is None:
        time_chunk = 32
    tc = max(1, min(time_chunk, T))
    Tp = _round_up(T, tc)

    # ---- pad parameters so gate slices / head outputs are vreg-aligned ----
    w_ih_p = _pad_gates_last(params["w_ih_t"], H, Hp)                   # (E, 4Hp)
    w_hh_p = _pad_gates_last(
        jnp.pad(params["w_hh_t"], ((0, Hp - H), (0, 0))), H, Hp)        # (Hp, 4Hp)
    b_g_p = _pad_gates_last(params["b_gates"], H, Hp)                   # (1, 4Hp)
    w_ln_p = jnp.pad(params["w_ln_t"], ((0, Hp - H), (0, Hp - H)))      # (Hp, Hp)
    b_ln_p = jnp.pad(params["b_ln"], ((0, 0), (0, Hp - H)))             # (1, Hp)
    w_fc_p = jnp.pad(params["w_fc_t"], ((0, Hp - H), (0, Cp - C)))      # (Hp, Cp)
    b_fc_p = jnp.pad(params["b_fc"], ((0, 0), (0, Cp - C)))             # (1, Cp)

    # ---- embedding gather, written directly time-major (no transpose pass) --
    tok_p = jnp.pad(x_tokens, ((0, Bp - B), (0, 0)))                    # (Bp, T)
    x_tbe = jnp.take(embed_w, tok_p.T, axis=0)                          # (T, Bp, E)
    if Tp != T:
        x_tbe = jnp.pad(x_tbe, ((0, Tp - T), (0, 0), (0, 0)))

    # ---- hoisted input projection: one tiled bf16 MXU matmul, gx stored bf16
    # TODO(synk): fold this per time chunk into the recurrence kernel to kill
    # the gx HBM round trip entirely (biggest payoff on v5e).
    gx = linear_pallas(x_tbe.reshape(Tp * Bp, E), w_ih_p, b_g_p,
                       out_dtype=jnp.bfloat16)                          # (Tp*Bp, 4Hp)
    gx = gx.reshape(Tp, Bp, 4 * Hp)

    # ---- streamed recurrence: (h, c) carried in VMEM scratch across chunks --
    hs = lstm_recurrence(gx, w_hh_p, time_chunk=tc)                     # (Tp,Bp,Hp) bf16
    if Tp != T:
        hs = hs[:T]

    # ---- ln_hidden head on time-major hs -> states land in (T, B, H) order --
    st = linear_pallas(hs.reshape(T * Bp, Hp), w_ln_p, b_ln_p)          # (T*Bp, Hp)
    states = st.reshape(T, Bp, Hp)[:, :B, :H]

    # ---- fc head on batch-major hs (small Hp-wide transpose) so the logits
    # are written directly in (B, T, C) order — no big post-fc transpose.
    hs_bt = jnp.transpose(hs, (1, 0, 2))                                # (Bp, T, Hp)
    logits = linear_pallas(hs_bt.reshape(Bp * T, Hp), w_fc_p, b_fc_p)   # (Bp*T, Cp)
    out = logits.reshape(Bp, T, Cp)[:B, :, :C]

    return out, states


# ----------------------------------------------------------------------------
# Pure-JAX reference for verification
# ----------------------------------------------------------------------------
def _reference_forward(x_tokens, params):
    B, T = x_tokens.shape
    H = params["w_hh_t"].shape[0]
    x_embed = jnp.take(params["embed_w"], x_tokens, axis=0)  # (B, T, E)

    def step(carry, x_t):
        h, c = carry
        gates = x_t @ params["w_ih_t"] + h @ params["w_hh_t"] + params["b_gates"][0]
        i_g = jax.nn.sigmoid(gates[:, 0 * H:1 * H])
        f_g = jax.nn.sigmoid(gates[:, 1 * H:2 * H])
        g_g = jnp.tanh(gates[:, 2 * H:3 * H])
        o_g = jax.nn.sigmoid(gates[:, 3 * H:4 * H])
        c_new = f_g * c + i_g * g_g
        h_new = o_g * jnp.tanh(c_new)
        return (h_new, c_new), h_new

    h0 = jnp.zeros((B, H), jnp.float32)
    c0 = jnp.zeros((B, H), jnp.float32)
    _, hs = jax.lax.scan(step, (h0, c0), jnp.transpose(x_embed, (1, 0, 2)))
    outputs = jnp.transpose(hs, (1, 0, 2))                    # (B, T, H)
    C = params["w_fc_t"].shape[1]
    out = (outputs.reshape(B * T, H) @ params["w_fc_t"] + params["b_fc"][0]
           ).reshape(B, T, C)
    states = (hs.reshape(T * B, H) @ params["w_ln_t"] + params["b_ln"][0]
              ).reshape(T, B, H)
    return out, states


# ----------------------------------------------------------------------------
# Deterministic parameter construction
# ----------------------------------------------------------------------------
def init_params(key, embed_size, hidden_size, num_classes):
    ks = jax.random.split(key, 8)
    E, H, C = embed_size, hidden_size, num_classes
    lim = 1.0 / np.sqrt(H)
    params = {
        # nn.Embedding(num_classes, embed_size), uniform(-0.1, 0.1)
        "embed_w": jax.random.uniform(ks[0], (C, E), jnp.float32, -0.1, 0.1),
        # nn.LSTMCell(E, H): weight_ih (4H, E), weight_hh (4H, H), two biases
        # stored transposed, with the two biases summed into one (1, 4H) row
        "w_ih_t": jax.random.uniform(ks[1], (E, 4 * H), jnp.float32, -lim, lim),
        "w_hh_t": jax.random.uniform(ks[2], (H, 4 * H), jnp.float32, -lim, lim),
        "b_gates": (jax.random.uniform(ks[3], (1, 4 * H), jnp.float32, -lim, lim)
                    + jax.random.uniform(ks[4], (1, 4 * H), jnp.float32, -lim, lim)),
        # nn.Linear(H, num_classes)
        "w_fc_t": jax.random.uniform(ks[5], (H, C), jnp.float32, -lim, lim),
        "b_fc": jax.random.uniform(ks[6], (1, C), jnp.float32, -lim, lim),
        # nn.Linear(H, H)  (ln_hidden, reverse=False path)
        "w_ln_t": jax.random.uniform(ks[7], (H, H), jnp.float32, -lim, lim),
        "b_ln": jnp.zeros((1, H), jnp.float32),
    }
    return params


if __name__ == "__main__":
    B, T = 2, 8
    embed_size, hidden_size, num_classes = 16, 32, 10

    key = jax.random.PRNGKey(0)
    k_param, k_tok = jax.random.split(key)
    params = init_params(k_param, embed_size, hidden_size, num_classes)
    x_tokens = jax.random.randint(k_tok, (B, T), 0, num_classes, dtype=jnp.int32)

    # time_chunk=4 -> 2 chunks, exercising the cross-chunk (h, c) scratch carry
    out, states = rnn_lstm_embed_twin_forward(x_tokens, params, time_chunk=4)
    out, states = jax.block_until_ready((out, states))

    # sanity check against a pure-JAX reference
    out_ref, states_ref = _reference_forward(x_tokens, params)
    assert out.shape == (B, T, num_classes)
    assert states.shape == (T, B, hidden_size)
    np.testing.assert_allclose(np.asarray(out), np.asarray(out_ref),
                               rtol=1e-2, atol=1e-2)
    np.testing.assert_allclose(np.asarray(states), np.asarray(states_ref),
                               rtol=1e-2, atol=1e-2)

    print("KERNEL_OK")
</pallas_src>

<mosaic_0001>
module attributes {stable_mosaic.version = 11 : i64} {
  func.func @_lstm_chunk_kernel(%arg0: i32, %arg1: memref<4x8x512xbf16, #tpu.memory_space<vmem>>, %arg2: memref<128x512xbf16, #tpu.memory_space<vmem>>, %arg3: memref<4x8x128xbf16, #tpu.memory_space<vmem>>, %arg4: memref<8x128xbf16, #tpu.memory_space<vmem>>, %arg5: memref<8x128xf32, #tpu.memory_space<vmem>>) attributes {dimension_semantics = [#tpu.dimension_semantics<arbitrary>], iteration_bounds = array<i64: 2>, scalar_prefetch = 0 : i64, scratch_operands = 2 : i64, tpu.core_type = #tpu.core_type<tc>, window_params = [{transform_indices = @transform_0, window_bounds = array<i64: 4, 8, 512>}, {pipeline_mode = #tpu.pipeline_mode<synchronous>, transform_indices = @transform_1, window_bounds = array<i64: 128, 512>}, {transform_indices = @transform_2, window_bounds = array<i64: 4, 8, 128>}]} {
    %c0_i32 = arith.constant 0 : i32
    %0 = arith.cmpi eq, %arg0, %c0_i32 : i32
    %1 = arith.extui %0 : i1 to i32
    %c0_i32_0 = arith.constant 0 : i32
    %2 = arith.cmpi ne, %1, %c0_i32_0 : i32
    scf.if %2 {
      %cst_42 = arith.constant 0.000000e+00 : bf16
      %152 = vector.broadcast %cst_42 : bf16 to vector<8x128xbf16>
      %c0_43 = arith.constant 0 : index
      %c0_44 = arith.constant 0 : index
      %153 = vector.load %arg4[%c0_43, %c0_44] : memref<8x128xbf16, #tpu.memory_space<vmem>>, vector<8x128xbf16>
      tpu.vector_store %arg4[%c0_43, %c0_44], %152 {strides = array<i32>} : memref<8x128xbf16, #tpu.memory_space<vmem>>, vector<8x128xbf16>,
      %cst_45 = arith.constant 0.000000e+00 : f32
      %154 = vector.broadcast %cst_45 : f32 to vector<8x128xf32>
      %c0_46 = arith.constant 0 : index
      %c0_47 = arith.constant 0 : index
      %155 = vector.load %arg5[%c0_46, %c0_47] : memref<8x128xf32, #tpu.memory_space<vmem>>, vector<8x128xf32>
      tpu.vector_store %arg5[%c0_46, %c0_47], %154 {strides = array<i32>} : memref<8x128xf32, #tpu.memory_space<vmem>>, vector<8x128xf32>,
    } else {
    }
    %c0 = arith.constant 0 : index
    %c0_1 = arith.constant 0 : index
    %3 = vector.load %arg2[%c0, %c0_1] : memref<128x512xbf16, #tpu.memory_space<vmem>>, vector<128x512xbf16>
    %c0_2 = arith.constant 0 : index
    %c0_3 = arith.constant 0 : index
    %4 = vector.load %arg4[%c0_2, %c0_3] : memref<8x128xbf16, #tpu.memory_space<vmem>>, vector<8x128xbf16>
    %c0_4 = arith.constant 0 : index
    %c0_5 = arith.constant 0 : index
    %5 = vector.load %arg5[%c0_4, %c0_5] : memref<8x128xf32, #tpu.memory_space<vmem>>, vector<8x128xf32>
    %c0_i32_6 = arith.constant 0 : i32
    %6 = arith.index_cast %c0_i32_6 : i32 to index
    %c0_7 = arith.constant 0 : index
    %c0_8 = arith.constant 0 : index
    %7 = vector.load %arg1[%6, %c0_7, %c0_8] : memref<4x8x512xbf16, #tpu.memory_space<vmem>>, vector<1x8x512xbf16>
    %8 = vector.shape_cast %7 : vector<1x8x512xbf16> to vector<8x512xbf16>
    %9 = arith.extf %8 : vector<8x512xbf16> to vector<8x512xf32>
    %cst = arith.constant dense<0.000000e+00> : vector<8x512xf32>
    %10 = tpu.matmul %4, %3, %cst {dimension_numbers = #tpu.dot_dimension_numbers<[1], [0], [0], [1], [0, 0, 1, 1], [], []>} : vector<8x128xbf16>, vector<128x512xbf16>, vector<8x512xf32> -> vector<8x512xf32>
    %11 = arith.addf %9, %10 : vector<8x512xf32>
    %12 = vector.extract_strided_slice %11 {offsets = [0, 0], sizes = [8, 128], strides = [1, 1]} : vector<8x512xf32> to vector<8x128xf32>
    %13 = arith.negf %12 : vector<8x128xf32>
    %14 = math.exp %13 : vector<8x128xf32>
    %cst_9 = arith.constant 1.000000e+00 : f32
    %15 = vector.broadcast %cst_9 : f32 to vector<8x128xf32>
    %16 = arith.addf %15, %14 : vector<8x128xf32>
    %17 = arith.divf %15, %16 : vector<8x128xf32>
    %18 = vector.extract_strided_slice %11 {offsets = [0, 128], sizes = [8, 128], strides = [1, 1]} : vector<8x512xf32> to vector<8x128xf32>
    %19 = arith.negf %18 : vector<8x128xf32>
    %20 = math.exp %19 : vector<8x128xf32>
    %cst_10 = arith.constant 1.000000e+00 : f32
    %21 = vector.broadcast %cst_10 : f32 to vector<8x128xf32>
    %22 = arith.addf %21, %20 : vector<8x128xf32>
    %23 = arith.divf %21, %22 : vector<8x128xf32>
    %24 = vector.extract_strided_slice %11 {offsets = [0, 256], sizes = [8, 128], strides = [1, 1]} : vector<8x512xf32> to vector<8x128xf32>
    %25 = math.tanh %24 : vector<8x128xf32>
    %26 = vector.extract_strided_slice %11 {offsets = [0, 384], sizes = [8, 128], strides = [1, 1]} : vector<8x512xf32> to vector<8x128xf32>
    %27 = arith.negf %26 : vector<8x128xf32>
    %28 = math.exp %27 : vector<8x128xf32>
    %cst_11 = arith.constant 1.000000e+00 : f32
    %29 = vector.broadcast %cst_11 : f32 to vector<8x128xf32>
    %30 = arith.addf %29, %28 : vector<8x128xf32>
    %31 = arith.divf %29, %30 : vector<8x128xf32>
    %32 = arith.mulf %23, %5 : vector<8x128xf32>
    %33 = arith.mulf %17, %25 : vector<8x128xf32>
    %34 = arith.addf %32, %33 : vector<8x128xf32>
    %35 = math.tanh %34 : vector<8x128xf32>
    %36 = arith.mulf %31, %35 : vector<8x128xf32>
    %37 = arith.truncf %36 : vector<8x128xf32> to vector<8x128xbf16>
    %38 = arith.index_cast %c0_i32_6 : i32 to index
    %c0_12 = arith.constant 0 : index
    %c0_13 = arith.constant 0 : index
    %39 = vector.load %arg3[%38, %c0_12, %c0_13] : memref<4x8x128xbf16, #tpu.memory_space<vmem>>, vector<1x8x128xbf16>
    %40 = vector.shape_cast %39 : vector<1x8x128xbf16> to vector<8x128xbf16>
    %41 = vector.shape_cast %37 : vector<8x128xbf16> to vector<1x8x128xbf16>
    tpu.vector_store %arg3[%38, %c0_12, %c0_13], %41 {strides = array<i32>} : memref<4x8x128xbf16, #tpu.memory_space<vmem>>, vector<1x8x128xbf16>,
    %c1_i32 = arith.constant 1 : i32
    %42 = arith.index_cast %c1_i32 : i32 to index
    %c0_14 = arith.constant 0 : index
    %c0_15 = arith.constant 0 : index
    %43 = vector.load %arg1[%42, %c0_14, %c0_15] : memref<4x8x512xbf16, #tpu.memory_space<vmem>>, vector<1x8x512xbf16>
    %44 = vector.shape_cast %43 : vector<1x8x512xbf16> to vector<8x512xbf16>
    %45 = arith.extf %44 : vector<8x512xbf16> to vector<8x512xf32>
    %cst_16 = arith.constant dense<0.000000e+00> : vector<8x512xf32>
    %46 = tpu.matmul %37, %3, %cst_16 {dimension_numbers = #tpu.dot_dimension_numbers<[1], [0], [0], [1], [0, 0, 1, 1], [], []>} : vector<8x128xbf16>, vector<128x512xbf16>, vector<8x512xf32> -> vector<8x512xf32>
    %47 = arith.addf %45, %46 : vector<8x512xf32>
    %48 = vector.extract_strided_slice %47 {offsets = [0, 0], sizes = [8, 128], strides = [1, 1]} : vector<8x512xf32> to vector<8x128xf32>
    %49 = arith.negf %48 : vector<8x128xf32>
    %50 = math.exp %49 : vector<8x128xf32>
    %cst_17 = arith.constant 1.000000e+00 : f32
    %51 = vector.broadcast %cst_17 : f32 to vector<8x128xf32>
    %52 = arith.addf %51, %50 : vector<8x128xf32>
    %53 = arith.divf %51, %52 : vector<8x128xf32>
    %54 = vector.extract_strided_slice %47 {offsets = [0, 128], sizes = [8, 128], strides = [1, 1]} : vector<8x512xf32> to vector<8x128xf32>
    %55 = arith.negf %54 : vector<8x128xf32>
    %56 = math.exp %55 : vector<8x128xf32>
    %cst_18 = arith.constant 1.000000e+00 : f32
    %57 = vector.broadcast %cst_18 : f32 to vector<8x128xf32>
    %58 = arith.addf %57, %56 : vector<8x128xf32>
    %59 = arith.divf %57, %58 : vector<8x128xf32>
    %60 = vector.extract_strided_slice %47 {offsets = [0, 256], sizes = [8, 128], strides = [1, 1]} : vector<8x512xf32> to vector<8x128xf32>
    %61 = math.tanh %60 : vector<8x128xf32>
    %62 = vector.extract_strided_slice %47 {offsets = [0, 384], sizes = [8, 128], strides = [1, 1]} : vector<8x512xf32> to vector<8x128xf32>
    %63 = arith.negf %62 : vector<8x128xf32>
    %64 = math.exp %63 : vector<8x128xf32>
    %cst_19 = arith.constant 1.000000e+00 : f32
    %65 = vector.broadcast %cst_19 : f32 to vector<8x128xf32>
    %66 = arith.addf %65, %64 : vector<8x128xf32>
    %67 = arith.divf %65, %66 : vector<8x128xf32>
    %68 = arith.mulf %59, %34 : vector<8x128xf32>
    %69 = arith.mulf %53, %61 : vector<8x128xf32>
    %70 = arith.addf %68, %69 : vector<8x128xf32>
    %71 = math.tanh %70 : vector<8x128xf32>
    %72 = arith.mulf %67, %71 : vector<8x128xf32>
    %73 = arith.truncf %72 : vector<8x128xf32> to vector<8x128xbf16>
    %74 = arith.index_cast %c1_i32 : i32 to index
    %c0_20 = arith.constant 0 : index
    %c0_21 = arith.constant 0 : index
    %75 = vector.load %arg3[%74, %c0_20, %c0_21] : memref<4x8x128xbf16, #tpu.memory_space<vmem>>, vector<1x8x128xbf16>
    %76 = vector.shape_cast %75 : vector<1x8x128xbf16> to vector<8x128xbf16>
    %77 = vector.shape_cast %73 : vector<8x128xbf16> to vector<1x8x128xbf16>
    tpu.vector_store %arg3[%74, %c0_20, %c0_21], %77 {strides = array<i32>} : memref<4x8x128xbf16, #tpu.memory_space<vmem>>, vector<1x8x128xbf16>,
    %c2_i32 = arith.constant 2 : i32
    %78 = arith.index_cast %c2_i32 : i32 to index
    %c0_22 = arith.constant 0 : index
    %c0_23 = arith.constant 0 : index
    %79 = vector.load %arg1[%78, %c0_22, %c0_23] : memref<4x8x512xbf16, #tpu.memory_space<vmem>>, vector<1x8x512xbf16>
    %80 = vector.shape_cast %79 : vector<1x8x512xbf16> to vector<8x512xbf16>
    %81 = arith.extf %80 : vector<8x512xbf16> to vector<8x512xf32>
    %cst_24 = arith.constant dense<0.000000e+00> : vector<8x512xf32>
    %82 = tpu.matmul %73, %3, %cst_24 {dimension_numbers = #tpu.dot_dimension_numbers<[1], [0], [0], [1], [0, 0, 1, 1], [], []>} : vector<8x128xbf16>, vector<128x512xbf16>, vector<8x512xf32> -> vector<8x512xf32>
    %83 = arith.addf %81, %82 : vector<8x512xf32>
    %84 = vector.extract_strided_slice %83 {offsets = [0, 0], sizes = [8, 128], strides = [1, 1]} : vector<8x512xf32> to vector<8x128xf32>
    %85 = arith.negf %84 : vector<8x128xf32>
    %86 = math.exp %85 : vector<8x128xf32>
    %cst_25 = arith.constant 1.000000e+00 : f32
    %87 = vector.broadcast %cst_25 : f32 to vector<8x128xf32>
    %88 = arith.addf %87, %86 : vector<8x128xf32>
    %89 = arith.divf %87, %88 : vector<8x128xf32>
    %90 = vector.extract_strided_slice %83 {offsets = [0, 128], sizes = [8, 128], strides = [1, 1]} : vector<8x512xf32> to vector<8x128xf32>
    %91 = arith.negf %90 : vector<8x128xf32>
    %92 = math.exp %91 : vector<8x128xf32>
    %cst_26 = arith.constant 1.000000e+00 : f32
    %93 = vector.broadcast %cst_26 : f32 to vector<8x128xf32>
    %94 = arith.addf %93, %92 : vector<8x128xf32>
    %95 = arith.divf %93, %94 : vector<8x128xf32>
    %96 = vector.extract_strided_slice %83 {offsets = [0, 256], sizes = [8, 128], strides = [1, 1]} : vector<8x512xf32> to vector<8x128xf32>
    %97 = math.tanh %96 : vector<8x128xf32>
    %98 = vector.extract_strided_slice %83 {offsets = [0, 384], sizes = [8, 128], strides = [1, 1]} : vector<8x512xf32> to vector<8x128xf32>
    %99 = arith.negf %98 : vector<8x128xf32>
    %100 = math.exp %99 : vector<8x128xf32>
    %cst_27 = arith.constant 1.000000e+00 : f32
    %101 = vector.broadcast %cst_27 : f32 to vector<8x128xf32>
    %102 = arith.addf %101, %100 : vector<8x128xf32>
    %103 = arith.divf %101, %102 : vector<8x128xf32>
    %104 = arith.mulf %95, %70 : vector<8x128xf32>
    %105 = arith.mulf %89, %97 : vector<8x128xf32>
    %106 = arith.addf %104, %105 : vector<8x128xf32>
    %107 = math.tanh %106 : vector<8x128xf32>
    %108 = arith.mulf %103, %107 : vector<8x128xf32>
    %109 = arith.truncf %108 : vector<8x128xf32> to vector<8x128xbf16>
    %110 = arith.index_cast %c2_i32 : i32 to index
    %c0_28 = arith.constant 0 : index
    %c0_29 = arith.constant 0 : index
    %111 = vector.load %arg3[%110, %c0_28, %c0_29] : memref<4x8x128xbf16, #tpu.memory_space<vmem>>, vector<1x8x128xbf16>
    %112 = vector.shape_cast %111 : vector<1x8x128xbf16> to vector<8x128xbf16>
    %113 = vector.shape_cast %109 : vector<8x128xbf16> to vector<1x8x128xbf16>
    tpu.vector_store %arg3[%110, %c0_28, %c0_29], %113 {strides = array<i32>} : memref<4x8x128xbf16, #tpu.memory_space<vmem>>, vector<1x8x128xbf16>,
    %c3_i32 = arith.constant 3 : i32
    %114 = arith.index_cast %c3_i32 : i32 to index
    %c0_30 = arith.constant 0 : index
    %c0_31 = arith.constant 0 : index
    %115 = vector.load %arg1[%114, %c0_30, %c0_31] : memref<4x8x512xbf16, #tpu.memory_space<vmem>>, vector<1x8x512xbf16>
    %116 = vector.shape_cast %115 : vector<1x8x512xbf16> to vector<8x512xbf16>
    %117 = arith.extf %116 : vector<8x512xbf16> to vector<8x512xf32>
    %cst_32 = arith.constant dense<0.000000e+00> : vector<8x512xf32>
    %118 = tpu.matmul %109, %3, %cst_32 {dimension_numbers = #tpu.dot_dimension_numbers<[1], [0], [0], [1], [0, 0, 1, 1], [], []>} : vector<8x128xbf16>, vector<128x512xbf16>, vector<8x512xf32> -> vector<8x512xf32>
    %119 = arith.addf %117, %118 : vector<8x512xf32>
    %120 = vector.extract_strided_slice %119 {offsets = [0, 0], sizes = [8, 128], strides = [1, 1]} : vector<8x512xf32> to vector<8x128xf32>
    %121 = arith.negf %120 : vector<8x128xf32>
    %122 = math.exp %121 : vector<8x128xf32>
    %cst_33 = arith.constant 1.000000e+00 : f32
    %123 = vector.broadcast %cst_33 : f32 to vector<8x128xf32>
    %124 = arith.addf %123, %122 : vector<8x128xf32>
    %125 = arith.divf %123, %124 : vector<8x128xf32>
    %126 = vector.extract_strided_slice %119 {offsets = [0, 128], sizes = [8, 128], strides = [1, 1]} : vector<8x512xf32> to vector<8x128xf32>
    %127 = arith.negf %126 : vector<8x128xf32>
    %128 = math.exp %127 : vector<8x128xf32>
    %cst_34 = arith.constant 1.000000e+00 : f32
    %129 = vector.broadcast %cst_34 : f32 to vector<8x128xf32>
    %130 = arith.addf %129, %128 : vector<8x128xf32>
    %131 = arith.divf %129, %130 : vector<8x128xf32>
    %132 = vector.extract_strided_slice %119 {offsets = [0, 256], sizes = [8, 128], strides = [1, 1]} : vector<8x512xf32> to vector<8x128xf32>
    %133 = math.tanh %132 : vector<8x128xf32>
    %134 = vector.extract_strided_slice %119 {offsets = [0, 384], sizes = [8, 128], strides = [1, 1]} : vector<8x512xf32> to vector<8x128xf32>
    %135 = arith.negf %134 : vector<8x128xf32>
    %136 = math.exp %135 : vector<8x128xf32>
    %cst_35 = arith.constant 1.000000e+00 : f32
    %137 = vector.broadcast %cst_35 : f32 to vector<8x128xf32>
    %138 = arith.addf %137, %136 : vector<8x128xf32>
    %139 = arith.divf %137, %138 : vector<8x128xf32>
    %140 = arith.mulf %131, %106 : vector<8x128xf32>
    %141 = arith.mulf %125, %133 : vector<8x128xf32>
    %142 = arith.addf %140, %141 : vector<8x128xf32>
    %143 = math.tanh %142 : vector<8x128xf32>
    %144 = arith.mulf %139, %143 : vector<8x128xf32>
    %145 = arith.truncf %144 : vector<8x128xf32> to vector<8x128xbf16>
    %146 = arith.index_cast %c3_i32 : i32 to index
    %c0_36 = arith.constant 0 : index
    %c0_37 = arith.constant 0 : index
    %147 = vector.load %arg3[%146, %c0_36, %c0_37] : memref<4x8x128xbf16, #tpu.memory_space<vmem>>, vector<1x8x128xbf16>
    %148 = vector.shape_cast %147 : vector<1x8x128xbf16> to vector<8x128xbf16>
    %149 = vector.shape_cast %145 : vector<8x128xbf16> to vector<1x8x128xbf16>
    tpu.vector_store %arg3[%146, %c0_36, %c0_37], %149 {strides = array<i32>} : memref<4x8x128xbf16, #tpu.memory_space<vmem>>, vector<1x8x128xbf16>,
    %c4_i32 = arith.constant 4 : i32
    %c0_38 = arith.constant 0 : index
    %c0_39 = arith.constant 0 : index
    %150 = vector.load %arg4[%c0_38, %c0_39] : memref<8x128xbf16, #tpu.memory_space<vmem>>, vector<8x128xbf16>
    tpu.vector_store %arg4[%c0_38, %c0_39], %145 {strides = array<i32>} : memref<8x128xbf16, #tpu.memory_space<vmem>>, vector<8x128xbf16>,
    %c0_40 = arith.constant 0 : index
    %c0_41 = arith.constant 0 : index
    %151 = vector.load %arg5[%c0_40, %c0_41] : memref<8x128xf32, #tpu.memory_space<vmem>>, vector<8x128xf32>
    tpu.vector_store %arg5[%c0_40, %c0_41], %142 {strides = array<i32>} : memref<8x128xf32, #tpu.memory_space<vmem>>, vector<8x128xf32>,
    return
  }
  func.func @transform_0(%arg0: i32) -> (i32, i32, i32) {
    %c0_i32 = arith.constant 0 : i32
    %c0_i32_0 = arith.constant 0 : i32
    %c0_i32_1 = arith.constant 0 : i32
    return %arg0, %c0_i32, %c0_i32_0 : i32, i32, i32
  }
  func.func @transform_1(%arg0: i32) -> (i32, i32) {
    %c0_i32 = arith.constant 0 : i32
    %c0_i32_0 = arith.constant 0 : i32
    %c0_i32_1 = arith.constant 0 : i32
    return %c0_i32, %c0_i32_0 : i32, i32
  }
  func.func @transform_2(%arg0: i32) -> (i32, i32, i32) {
    %c0_i32 = arith.constant 0 : i32
    %c0_i32_0 = arith.constant 0 : i32
    %c0_i32_1 = arith.constant 0 : i32
    return %arg0, %c0_i32, %c0_i32_0 : i32, i32, i32
  }
}

module attributes {stable_mosaic.version = 11 : i64} {
  func.func @_linear_kernel(%arg0: i32, %arg1: i32, %arg2: i32, %arg3: memref<64x16xbf16, #tpu.memory_space<vmem>>, %arg4: memref<16x512xbf16, #tpu.memory_space<vmem>>, %arg5: memref<1x512xf32, #tpu.memory_space<vmem>>, %arg6: memref<64x512xbf16, #tpu.memory_space<vmem>>, %arg7: memref<64x512xf32, #tpu.memory_space<vmem>>) attributes {dimension_semantics = [#tpu.dimension_semantics<parallel>, #tpu.dimension_semantics<parallel>, #tpu.dimension_semantics<arbitrary>], iteration_bounds = array<i64: 1, 1, 1>, scalar_prefetch = 0 : i64, scratch_operands = 1 : i64, tpu.core_type = #tpu.core_type<tc>, window_params = [{transform_indices = @transform_0, window_bounds = array<i64: 64, 16>}, {transform_indices = @transform_1, window_bounds = array<i64: 16, 512>}, {transform_indices = @transform_2, window_bounds = array<i64: 1, 512>}, {transform_indices = @transform_3, window_bounds = array<i64: 64, 512>}]} {
    %c0_i32 = arith.constant 0 : i32
    %0 = arith.cmpi eq, %arg2, %c0_i32 : i32
    %1 = arith.extui %0 : i1 to i32
    %c0_i32_0 = arith.constant 0 : i32
    %2 = arith.cmpi ne, %1, %c0_i32_0 : i32
    scf.if %2 {
      %cst_10 = arith.constant 0.000000e+00 : f32
      %12 = vector.broadcast %cst_10 : f32 to vector<64x512xf32>
      %c0_11 = arith.constant 0 : index
      %c0_12 = arith.constant 0 : index
      %13 = vector.load %arg7[%c0_11, %c0_12] : memref<64x512xf32, #tpu.memory_space<vmem>>, vector<64x512xf32>
      tpu.vector_store %arg7[%c0_11, %c0_12], %12 {strides = array<i32>} : memref<64x512xf32, #tpu.memory_space<vmem>>, vector<64x512xf32>,
    } else {
    }
    %c0 = arith.constant 0 : index
    %c0_1 = arith.constant 0 : index
    %3 = vector.load %arg7[%c0, %c0_1] : memref<64x512xf32, #tpu.memory_space<vmem>>, vector<64x512xf32>
    %c0_2 = arith.constant 0 : index
    %c0_3 = arith.constant 0 : index
    %4 = vector.load %arg3[%c0_2, %c0_3] : memref<64x16xbf16, #tpu.memory_space<vmem>>, vector<64x16xbf16>
    %c0_4 = arith.constant 0 : index
    %c0_5 = arith.constant 0 : index
    %5 = vector.load %arg4[%c0_4, %c0_5] : memref<16x512xbf16, #tpu.memory_space<vmem>>, vector<16x512xbf16>
    %cst = arith.constant dense<0.000000e+00> : vector<64x512xf32>
    %6 = tpu.matmul %4, %5, %cst {dimension_numbers = #tpu.dot_dimension_numbers<[1], [0], [0], [1], [0, 0, 1, 1], [], []>} : vector<64x16xbf16>, vector<16x512xbf16>, vector<64x512xf32> -> vector<64x512xf32>
    %7 = arith.addf %3, %6 : vector<64x512xf32>
    %c0_6 = arith.constant 0 : index
    %c0_7 = arith.constant 0 : index
    %8 = vector.load %arg7[%c0_6, %c0_7] : memref<64x512xf32, #tpu.memory_space<vmem>>, vector<64x512xf32>
    tpu.vector_store %arg7[%c0_6, %c0_7], %7 {strides = array<i32>} : memref<64x512xf32, #tpu.memory_space<vmem>>, vector<64x512xf32>,
    %c0_i32_8 = arith.constant 0 : i32
    %9 = arith.cmpi eq, %arg2, %c0_i32_8 : i32
    %10 = arith.extui %9 : i1 to i32
    %c0_i32_9 = arith.constant 0 : i32
    %11 = arith.cmpi ne, %10, %c0_i32_9 : i32
    scf.if %11 {
      %c0_10 = arith.constant 0 : index
      %c0_11 = arith.constant 0 : index
      %12 = vector.load %arg7[%c0_10, %c0_11] : memref<64x512xf32, #tpu.memory_space<vmem>>, vector<64x512xf32>
      %c0_12 = arith.constant 0 : index
      %c0_13 = arith.constant 0 : index
      %13 = vector.load %arg5[%c0_12, %c0_13] : memref<1x512xf32, #tpu.memory_space<vmem>>, vector<1x512xf32>
      %14 = vector.broadcast %13 : vector<1x512xf32> to vector<64x512xf32>
      %15 = arith.addf %12, %14 : vector<64x512xf32>
      %16 = arith.truncf %15 : vector<64x512xf32> to vector<64x512xbf16>
      %c0_14 = arith.constant 0 : index
      %c0_15 = arith.constant 0 : index
      %17 = vector.load %arg6[%c0_14, %c0_15] : memref<64x512xbf16, #tpu.memory_space<vmem>>, vector<64x512xbf16>
      tpu.vector_store %arg6[%c0_14, %c0_15], %16 {strides = array<i32>} : memref<64x512xbf16, #tpu.memory_space<vmem>>, vector<64x512xbf16>,
    } else {
    }
    return
  }
  func.func @transform_0(%arg0: i32, %arg1: i32, %arg2: i32) -> (i32, i32) {
    %c0_i32 = arith.constant 0 : i32
    return %arg0, %arg2 : i32, i32
  }
  func.func @transform_1(%arg0: i32, %arg1: i32, %arg2: i32) -> (i32, i32) {
    %c0_i32 = arith.constant 0 : i32
    return %arg2, %arg1 : i32, i32
  }
  func.func @transform_2(%arg0: i32, %arg1: i32, %arg2: i32) -> (i32, i32) {
    %c0_i32 = arith.constant 0 : i32
    %c0_i32_0 = arith.constant 0 : i32
    return %c0_i32, %arg1 : i32, i32
  }
  func.func @transform_3(%arg0: i32, %arg1: i32, %arg2: i32) -> (i32, i32) {
    %c0_i32 = arith.constant 0 : i32
    return %arg0, %arg1 : i32, i32
  }
}

module attributes {stable_mosaic.version = 11 : i64} {
  func.func @_linear_kernel(%arg0: i32, %arg1: i32, %arg2: i32, %arg3: memref<64x128xbf16, #tpu.memory_space<vmem>>, %arg4: memref<128x128xbf16, #tpu.memory_space<vmem>>, %arg5: memref<1x128xf32, #tpu.memory_space<vmem>>, %arg6: memref<64x128xf32, #tpu.memory_space<vmem>>, %arg7: memref<64x128xf32, #tpu.memory_space<vmem>>) attributes {dimension_semantics = [#tpu.dimension_semantics<parallel>, #tpu.dimension_semantics<parallel>, #tpu.dimension_semantics<arbitrary>], iteration_bounds = array<i64: 1, 1, 1>, scalar_prefetch = 0 : i64, scratch_operands = 1 : i64, tpu.core_type = #tpu.core_type<tc>, window_params = [{transform_indices = @transform_0, window_bounds = array<i64: 64, 128>}, {transform_indices = @transform_1, window_bounds = array<i64: 128, 128>}, {transform_indices = @transform_2, window_bounds = array<i64: 1, 128>}, {transform_indices = @transform_3, window_bounds = array<i64: 64, 128>}]} {
    %c0_i32 = arith.constant 0 : i32
    %0 = arith.cmpi eq, %arg2, %c0_i32 : i32
    %1 = arith.extui %0 : i1 to i32
    %c0_i32_0 = arith.constant 0 : i32
    %2 = arith.cmpi ne, %1, %c0_i32_0 : i32
    scf.if %2 {
      %cst_10 = arith.constant 0.000000e+00 : f32
      %12 = vector.broadcast %cst_10 : f32 to vector<64x128xf32>
      %c0_11 = arith.constant 0 : index
      %c0_12 = arith.constant 0 : index
      %13 = vector.load %arg7[%c0_11, %c0_12] : memref<64x128xf32, #tpu.memory_space<vmem>>, vector<64x128xf32>
      tpu.vector_store %arg7[%c0_11, %c0_12], %12 {strides = array<i32>} : memref<64x128xf32, #tpu.memory_space<vmem>>, vector<64x128xf32>,
    } else {
    }
    %c0 = arith.constant 0 : index
    %c0_1 = arith.constant 0 : index
    %3 = vector.load %arg7[%c0, %c0_1] : memref<64x128xf32, #tpu.memory_space<vmem>>, vector<64x128xf32>
    %c0_2 = arith.constant 0 : index
    %c0_3 = arith.constant 0 : index
    %4 = vector.load %arg3[%c0_2, %c0_3] : memref<64x128xbf16, #tpu.memory_space<vmem>>, vector<64x128xbf16>
    %c0_4 = arith.constant 0 : index
    %c0_5 = arith.constant 0 : index
    %5 = vector.load %arg4[%c0_4, %c0_5] : memref<128x128xbf16, #tpu.memory_space<vmem>>, vector<128x128xbf16>
    %cst = arith.constant dense<0.000000e+00> : vector<64x128xf32>
    %6 = tpu.matmul %4, %5, %cst {dimension_numbers = #tpu.dot_dimension_numbers<[1], [0], [0], [1], [0, 0, 1, 1], [], []>} : vector<64x128xbf16>, vector<128x128xbf16>, vector<64x128xf32> -> vector<64x128xf32>
    %7 = arith.addf %3, %6 : vector<64x128xf32>
    %c0_6 = arith.constant 0 : index
    %c0_7 = arith.constant 0 : index
    %8 = vector.load %arg7[%c0_6, %c0_7] : memref<64x128xf32, #tpu.memory_space<vmem>>, vector<64x128xf32>
    tpu.vector_store %arg7[%c0_6, %c0_7], %7 {strides = array<i32>} : memref<64x128xf32, #tpu.memory_space<vmem>>, vector<64x128xf32>,
    %c0_i32_8 = arith.constant 0 : i32
    %9 = arith.cmpi eq, %arg2, %c0_i32_8 : i32
    %10 = arith.extui %9 : i1 to i32
    %c0_i32_9 = arith.constant 0 : i32
    %11 = arith.cmpi ne, %10, %c0_i32_9 : i32
    scf.if %11 {
      %c0_10 = arith.constant 0 : index
      %c0_11 = arith.constant 0 : index
      %12 = vector.load %arg7[%c0_10, %c0_11] : memref<64x128xf32, #tpu.memory_space<vmem>>, vector<64x128xf32>
      %c0_12 = arith.constant 0 : index
      %c0_13 = arith.constant 0 : index
      %13 = vector.load %arg5[%c0_12, %c0_13] : memref<1x128xf32, #tpu.memory_space<vmem>>, vector<1x128xf32>
      %14 = vector.broadcast %13 : vector<1x128xf32> to vector<64x128xf32>
      %15 = arith.addf %12, %14 : vector<64x128xf32>
      %c0_14 = arith.constant 0 : index
      %c0_15 = arith.constant 0 : index
      %16 = vector.load %arg6[%c0_14, %c0_15] : memref<64x128xf32, #tpu.memory_space<vmem>>, vector<64x128xf32>
      tpu.vector_store %arg6[%c0_14, %c0_15], %15 {strides = array<i32>} : memref<64x128xf32, #tpu.memory_space<vmem>>, vector<64x128xf32>,
    } else {
    }
    return
  }
  func.func @transform_0(%arg0: i32, %arg1: i32, %arg2: i32) -> (i32, i32) {
    %c0_i32 = arith.constant 0 : i32
    return %arg0, %arg2 : i32, i32
  }
  func.func @transform_1(%arg0: i32, %arg1: i32, %arg2: i32) -> (i32, i32) {
    %c0_i32 = arith.constant 0 : i32
    return %arg2, %arg1 : i32, i32
  }
  func.func @transform_2(%arg0: i32, %arg1: i32, %arg2: i32) -> (i32, i32) {
    %c0_i32 = arith.constant 0 : i32
    %c0_i32_0 = arith.constant 0 : i32
    return %c0_i32, %arg1 : i32, i32
  }
  func.func @transform_3(%arg0: i32, %arg1: i32, %arg2: i32) -> (i32, i32) {
    %c0_i32 = arith.constant 0 : i32
    return %arg0, %arg1 : i32, i32
  }
}

</mosaic_0001>

<bundles_post_ra>
// kernel: rnn_lstm_embed_twin_forward.7
= control target key start
LH: loop header
LB: loop body
LE: loop exit
PB: predicated region body
PF: predicated region fallthrough
CT: control target
= control target key end

     0   :  { %s378_s1 = inlined_call_operand.vmem [shape: bf16[128,128], index: 1, kind: input, shape index: {}]   ;;  %s379_s2 = inlined_call_operand.vmem [shape: f32[1,128], index: 2, kind: input, shape index: {}]   ;;  %s380_s0 = inlined_call_operand.vmem [shape: bf16[64,128], index: 0, kind: input, shape index: {}]   ;;  %s381_s3 = inlined_call_operand.vmem [shape: f32[64,128], index: 3, kind: output, shape index: {}]  }
   0x1   :  { %v269_v0 = vld [vmem:[%s378_s1 + $0x38] sm:$0xff]  ;;  %v268_v1 = vld [vmem:[%s378_s1 + $0x30] sm:$0xff]  ;;  %v267_v2 = vld [vmem:[%s378_s1 + $0x28] sm:$0xff] }
   0x2   :  { %130 = vmatpush.bf16.msra.mxu0 %v269_v0  ;;  %270 = vmatpush.bf16.msra.mxu1 %v269_v0  ;;  %v266_v3 = vld [vmem:[%s378_s1 + $0x20] sm:$0xff]  ;;  %v265_v4 = vld [vmem:[%s378_s1 + $0x18] sm:$0xff]  ;;  %v264_v5 = vld [vmem:[%s378_s1 + $0x10] sm:$0xff] }
   0x3   :  { %271 = vmatpush.bf16.msra.mxu2 %v269_v0  ;;  %272 = vmatpush.bf16.msra.mxu3 %v269_v0  ;;  %v263_v6 = vld [vmem:[%s378_s1 + $0x8] sm:$0xff]  ;;  %v262_v7 = vld [vmem:[%s378_s1] sm:$0xff]  ;;  %v260_v10 = vld [vmem:[%s380_s0 + $0x10] sm:$0xff] }
   0x4   :  { %v258_v8 = vld [vmem:[%s380_s0] sm:$0xff]  ;;  %v259_v9 = vld [vmem:[%s380_s0 + $0x8] sm:$0xff]  ;;  %v261_v11 = vld [vmem:[%s380_s0 + $0x18] sm:$0xff] }
   0x5   :  { %v294_v12 = vld [vmem:[%s379_s2] ss:$0 sm:$0xff] }
   0x6   :  { %131 = vmatpush.bf16.msra.mxu0 %v268_v1  ;;  %273 = vmatpush.bf16.msra.mxu1 %v268_v1 }
   0x7   :  { %274 = vmatpush.bf16.msra.mxu2 %v268_v1  ;;  %275 = vmatpush.bf16.msra.mxu3 %v268_v1 }
   0xa   :  { %132 = vmatpush.bf16.msra.mxu0 %v267_v2  ;;  %276 = vmatpush.bf16.msra.mxu1 %v267_v2 }
   0xb   :  { %277 = vmatpush.bf16.msra.mxu2 %v267_v2  ;;  %278 = vmatpush.bf16.msra.mxu3 %v267_v2 }
   0xe   :  { %133 = vmatpush.bf16.msra.mxu0 %v266_v3  ;;  %279 = vmatpush.bf16.msra.mxu1 %v266_v3 }
   0xf   :  { %280 = vmatpush.bf16.msra.mxu2 %v266_v3  ;;  %281 = vmatpush.bf16.msra.mxu3 %v266_v3 }
  0x12   :  { %134 = vmatpush.bf16.msra.mxu0 %v265_v4  ;;  %282 = vmatpush.bf16.msra.mxu1 %v265_v4 }
  0x13   :  { %283 = vmatpush.bf16.msra.mxu2 %v265_v4  ;;  %284 = vmatpush.bf16.msra.mxu3 %v265_v4 }
  0x16   :  { %135 = vmatpush.bf16.msra.mxu0 %v264_v5  ;;  %285 = vmatpush.bf16.msra.mxu1 %v264_v5 }
  0x17   :  { %286 = vmatpush.bf16.msra.mxu2 %v264_v5  ;;  %287 = vmatpush.bf16.msra.mxu3 %v264_v5 }
  0x1a   :  { %136 = vmatpush.bf16.msra.mxu0 %v263_v6  ;;  %288 = vmatpush.bf16.msra.mxu1 %v263_v6 }
  0x1b   :  { %289 = vmatpush.bf16.msra.mxu2 %v263_v6  ;;  %290 = vmatpush.bf16.msra.mxu3 %v263_v6 }
  0x1e   :  { %137 = vmatpush.bf16.msra.mxu0 %v262_v7  ;;  %291 = vmatpush.bf16.msra.mxu1 %v262_v7 }
  0x1f   :  { %292 = vmatpush.bf16.msra.mxu2 %v262_v7  ;;  %293 = vmatpush.bf16.msra.mxu3 %v262_v7 }
  0x21   :  { %138 = vmatmul.bf16.vlgmr.msra.gmra.mxu0 %v258_v8  ;;  %143 = vmatmul.bf16.vlgmr.msra.gmra.mxu1 %v259_v9 }
  0x22   :  { %148 = vmatmul.bf16.vlgmr.msra.gmra.mxu2 %v260_v10  ;;  %153 = vmatmul.bf16.vlgmr.msra.gmra.mxu3 %v261_v11 }
  0x9e   :  { %v139_v13 = vpop.f32.mrf.mxu0  ;;  %v144_v14 = vpop.f32.mrf.mxu1 }
  0x9f   :  { %v190_v15 = vadd.f32 %v294_v12, %v139_v13  ;;  %v192_v16 = vadd.f32 %v294_v12, %v144_v14 }
  0xa1   :  { %198 = vst [vmem:[%s381_s3] sm:$0xff] %v190_v15 }
  0xa2   :  { %200 = vst [vmem:[%s381_s3 + $0x10] sm:$0xff] %v192_v16 }
  0xa5   :  { %v149_v17 = vpop.f32.mrf.mxu2  ;;  %v154_v18 = vpop.f32.mrf.mxu3 }
  0xa6   :  { %v194_v19 = vadd.f32 %v294_v12, %v149_v17  ;;  %v196_v20 = vadd.f32 %v294_v12, %v154_v18  ;;  %v141_v21 = vpop.f32.mrf.mxu0  ;;  %v146_v22 = vpop.f32.mrf.mxu1 }
  0xa7   :  { %v191_v23 = vadd.f32 %v294_v12, %v141_v21  ;;  %v193_v24 = vadd.f32 %v294_v12, %v146_v22 }
  0xa8   :  { %202 = vst [vmem:[%s381_s3 + $0x20] sm:$0xff] %v194_v19 }
  0xa9   :  { %204 = vst [vmem:[%s381_s3 + $0x30] sm:$0xff] %v196_v20 }
  0xaa   :  { %199 = vst [vmem:[%s381_s3 + $0x8] sm:$0xff] %v191_v23 }
  0xab   :  { %201 = vst [vmem:[%s381_s3 + $0x18] sm:$0xff] %v193_v24 }
  0xad   :  { %v151_v25 = vpop.f32.mrf.mxu2  ;;  %v156_v26 = vpop.f32.mrf.mxu3 }
  0xae   :  { %v195_v27 = vadd.f32 %v294_v12, %v151_v25  ;;  %v197_v28 = vadd.f32 %v294_v12, %v156_v26 }
  0xb0   :  { %203 = vst [vmem:[%s381_s3 + $0x28] sm:$0xff] %v195_v27 }
  0xb1   :  { %205 = vst [vmem:[%s381_s3 + $0x38] sm:$0xff] %v197_v28 }

// kernel: rnn_lstm_embed_twin_forward.5
= control target key start
LH: loop header
LB: loop body
LE: loop exit
PB: predicated region body
PF: predicated region fallthrough
CT: control target
= control target key end

     0   :  { %s1217_s9 = smov 0   ;;  %s1646_s0 = inlined_call_operand.vmem [shape: bf16[8,8,512], index: 0, kind: input, shape index: {}]   ;;  %s1647_s1 = inlined_call_operand.vmem [shape: bf16[128,512], index: 1, kind: input, shape index: {}]   ;;  %s1648_s2 = inlined_call_operand.vmem [shape: bf16[8,8,128], index: 2, kind: output, shape index: {}]  }
   0x1 LB: > { %s923_s10 = sadd.s32 4294967295, %s1198_s9   ;;  %p927_p0 = scmp.ge.s32.totalorder %s1198_s9, 1  ;;  %s1198_s9 = sphi %s1217_s9, %s12_s9  }
   0x2   : > { %p114_p1 = scmp.lt.s32.totalorder %s1198_s9, 3 }
   0x4   : > { %p115_p2 = pnand %p927_p0, %p114_p1 }
   0x5   : > { %s928_s11 = sshll.u32 (!%p115_p2), %s923_s10, 2  ;;  %p933_p4 = scmp.ne.s32.totalorder (!%p115_p2), %s923_s10, 0 }
   0x6   : > { %118 = sbr.rel (%p115_p2) target bundleno = 744 (0x2e8), region = 28  ;;  %p138_p3 = scmp.lt.s32.totalorder (!%p115_p2), %s928_s11, 7 }
   0xb   : > { %s1650_s11 = smov (!%p138_p3, %s928_s11), 7  ;;  %154 = sbr.rel (%p933_p4) target bundleno = 19 (0x13), region = 32 }
   0xc   : > { %s1085_s12 = sshll.u32 %s1650_s11, 4  ;;  %s932_s13 = sshll.u32 %s1650_s11, 2 }
   0xd   : > { %s1228_s16 = scalar_lea.vmem %s1646_s0, %s1085_s12  ;;  %s1233_s19 = scalar_lea.vmem %s1648_s2, %s932_s13 }
  0x10   : > { %v1200_v0 = vmov 0   ;;  %v1201_v1 = vmov 0.0  }
  0x11   : > { %155 = vst [vmem:[#allocation2] sm:$0xf] %v1200_v0 }
  0x12   : > { %156 = vst [vmem:[#allocation3] sm:$0xff] %v1201_v1 }
  0x13 PF: > { %v1048_v2 = vld [vmem:[%s1647_s1 + $0xe0] sm:$0xf]  ;;  %v1116_v3 = vld [vmem:[%s1647_s1 + $0xec] sm:$0xf0]  ;;  %v1114_v4 = vld [vmem:[%s1647_s1 + $0xe4] sm:$0xf] }
  0x14   : > { %v1244_v5 = vor.u32 %v1116_v3, %v1048_v2  ;;  %v1050_v6 = vld [vmem:[%s1647_s1 + $0xf0] sm:$0xf0]  ;;  %v1115_v7 = vld [vmem:[%s1647_s1 + $0xec] sm:$0xf]  ;;  %v1058_v8 = vld [vmem:[%s1647_s1 + $0xf8] sm:$0xf0] }
  0x15   : > { %v1255_v9 = vor.u32 %v1114_v4, %v1050_v6  ;;  %v1257_v10 = vor.u32 %v1115_v7, %v1058_v8  ;;  %v1032_v11 = vld [vmem:[%s1647_s1 + $0xc0] sm:$0xf]  ;;  %v1112_v12 = vld [vmem:[%s1647_s1 + $0xcc] sm:$0xf0]  ;;  %v1110_v13 = vld [vmem:[%s1647_s1 + $0xc4] sm:$0xf] }
  0x16   : > { %357 = vmatpush.bf16.msra.mxu0 %v1244_v5  ;;  %v1269_v14 = vor.u32 %v1112_v12, %v1032_v11  ;;  %v1034_v15 = vld [vmem:[%s1647_s1 + $0xd0] sm:$0xf0]  ;;  %v1111_v16 = vld [vmem:[%s1647_s1 + $0xcc] sm:$0xf]  ;;  %v1042_v17 = vld [vmem:[%s1647_s1 + $0xd8] sm:$0xf0] }
  0x17   : > { %370 = vmatpush.bf16.msra.mxu1 %v1255_v9  ;;  %396 = vmatpush.bf16.msra.mxu3 %v1257_v10  ;;  %v1282_v18 = vor.u32 %v1110_v13, %v1034_v15  ;;  %v1284_v19 = vor.u32 %v1111_v16, %v1042_v17  ;;  %v1056_v20 = vld [vmem:[%s1647_s1 + $0xe8] sm:$0xf]  ;;  %v1117_v21 = vld [vmem:[%s1647_s1 + $0xf4] sm:$0xf0]  ;;  %v1016_v22 = vld [vmem:[%s1647_s1 + $0xa0] sm:$0xf] }
  0x18   : > { %v1295_v23 = vor.u32 %v1117_v21, %v1056_v20  ;;  %v1108_v24 = vld [vmem:[%s1647_s1 + $0xac] sm:$0xf0]  ;;  %v1106_v25 = vld [vmem:[%s1647_s1 + $0xa4] sm:$0xf]  ;;  %v1018_v26 = vld [vmem:[%s1647_s1 + $0xb0] sm:$0xf0] }
  0x19   : > { %v1107_v27 = vld [vmem:[%s1647_s1 + $0xac] sm:$0xf]  ;;  %v1026_v28 = vld [vmem:[%s1647_s1 + $0xb8] sm:$0xf0]  ;;  %v1040_v29 = vld [vmem:[%s1647_s1 + $0xc8] sm:$0xf]  ;;  %v1317_v30 = vor.u32 %v1108_v24, %v1016_v22  ;;  %v1330_v34 = vor.u32 %v1106_v25, %v1018_v26 }
  0x1a   : > { %358 = vmatpush.bf16.msra.mxu0 %v1269_v14  ;;  %383 = vmatpush.bf16.msra.mxu2 %v1295_v23  ;;  %v1113_v31 = vld [vmem:[%s1647_s1 + $0xd4] sm:$0xf0]  ;;  %v1000_v32 = vld [vmem:[%s1647_s1 + $0x80] sm:$0xf]  ;;  %v1104_v33 = vld [vmem:[%s1647_s1 + $0x8c] sm:$0xf0]  ;;  %v1332_v35 = vor.u32 %v1107_v27, %v1026_v28 }
  0x1b   : > { %371 = vmatpush.bf16.msra.mxu1 %v1282_v18  ;;  %397 = vmatpush.bf16.msra.mxu3 %v1284_v19  ;;  %v1334_v36 = vor.u32 %v1113_v31, %v1040_v29  ;;  %v1102_v37 = vld [vmem:[%s1647_s1 + $0x84] sm:$0xf]  ;;  %v1002_v38 = vld [vmem:[%s1647_s1 + $0x90] sm:$0xf0]  ;;  %v1103_v39 = vld [vmem:[%s1647_s1 + $0x8c] sm:$0xf]  ;;  %v1356_v43 = vor.u32 %v1104_v33, %v1000_v32 }
  0x1c   : > { %v1010_v40 = vld [vmem:[%s1647_s1 + $0x98] sm:$0xf0]  ;;  %v1024_v41 = vld [vmem:[%s1647_s1 + $0xa8] sm:$0xf]  ;;  %v1109_v42 = vld [vmem:[%s1647_s1 + $0xb4] sm:$0xf0]  ;;  %v1368_v47 = vor.u32 %v1102_v37, %v1002_v38 }
  0x1d   : > { %v1358_v44 = vor.u32 %v1109_v42, %v1024_v41  ;;  %v984_v45 = vld [vmem:[%s1647_s1 + $0x60] sm:$0xf]  ;;  %v1100_v46 = vld [vmem:[%s1647_s1 + $0x6c] sm:$0xf0]  ;;  %v1370_v48 = vor.u32 %v1103_v39, %v1010_v40  ;;  %v1098_v49 = vld [vmem:[%s1647_s1 + $0x64] sm:$0xf] }
  0x1e   : > { %359 = vmatpush.bf16.msra.mxu0 %v1317_v30  ;;  %384 = vmatpush.bf16.msra.mxu2 %v1334_v36  ;;  %v1008_v50 = vld [vmem:[%s1647_s1 + $0x88] sm:$0xf]  ;;  %v1105_v51 = vld [vmem:[%s1647_s1 + $0x94] sm:$0xf0]  ;;  %v986_v52 = vld [vmem:[%s1647_s1 + $0x70] sm:$0xf0]  ;;  %v1392_v55 = vor.u32 %v1100_v46, %v984_v45 }
  0x1f   : > { %372 = vmatpush.bf16.msra.mxu1 %v1330_v34  ;;  %398 = vmatpush.bf16.msra.mxu3 %v1332_v35  ;;  %v1099_v53 = vld [vmem:[%s1647_s1 + $0x6c] sm:$0xf]  ;;  %v994_v54 = vld [vmem:[%s1647_s1 + $0x78] sm:$0xf0]  ;;  %v1394_v56 = vor.u32 %v1105_v51, %v1008_v50  ;;  %v968_v57 = vld [vmem:[%s1647_s1 + $0x40] sm:$0xf]  ;;  %v1404_v59 = vor.u32 %v1098_v49, %v986_v52 }
  0x20   : > { %v1096_v58 = vld [vmem:[%s1647_s1 + $0x4c] sm:$0xf0]  ;;  %v1406_v60 = vor.u32 %v1099_v53, %v994_v54  ;;  %v1094_v61 = vld [vmem:[%s1647_s1 + $0x44] sm:$0xf]  ;;  %v992_v62 = vld [vmem:[%s1647_s1 + $0x68] sm:$0xf] }
  0x21   : > { %v1101_v63 = vld [vmem:[%s1647_s1 + $0x74] sm:$0xf0]  ;;  %v970_v0 = vld [vmem:[%s1647_s1 + $0x50] sm:$0xf0]  ;;  %v1095_v1 = vld [vmem:[%s1647_s1 + $0x4c] sm:$0xf]  ;;  %v1428_v3 = vor.u32 %v1096_v58, %v968_v57 }
  0x22   : > { %360 = vmatpush.bf16.msra.mxu0 %v1356_v43  ;;  %385 = vmatpush.bf16.msra.mxu2 %v1358_v44  ;;  %v978_v2 = vld [vmem:[%s1647_s1 + $0x58] sm:$0xf0]  ;;  %v1430_v4 = vor.u32 %v1101_v63, %v992_v62  ;;  %v952_v6 = vld [vmem:[%s1647_s1 + $0x20] sm:$0xf]  ;;  %v1092_v7 = vld [vmem:[%s1647_s1 + $0x2c] sm:$0xf0]  ;;  %v1440_v8 = vor.u32 %v1094_v61, %v970_v0 }
  0x23   : > { %373 = vmatpush.bf16.msra.mxu1 %v1368_v47  ;;  %399 = vmatpush.bf16.msra.mxu3 %v1370_v48  ;;  %v1442_v11 = vor.u32 %v1095_v1, %v978_v2  ;;  %v1090_v12 = vld [vmem:[%s1647_s1 + $0x24] sm:$0xf]  ;;  %v976_v13 = vld [vmem:[%s1647_s1 + $0x48] sm:$0xf]  ;;  %v1097_v15 = vld [vmem:[%s1647_s1 + $0x54] sm:$0xf0]  ;;  %v1464_v21 = vor.u32 %v1092_v7, %v952_v6 }
  0x24   : > { %v954_v16 = vld [vmem:[%s1647_s1 + $0x30] sm:$0xf0]  ;;  %v1091_v17 = vld [vmem:[%s1647_s1 + $0x2c] sm:$0xf]  ;;  %v962_v20 = vld [vmem:[%s1647_s1 + $0x38] sm:$0xf0]  ;;  %v1466_v22 = vor.u32 %v1097_v15, %v976_v13 }
  0x25   : > { %v936_v24 = vld [vmem:[%s1647_s1] sm:$0xf]  ;;  %v1088_v25 = vld [vmem:[%s1647_s1 + $0xc] sm:$0xf0]  ;;  %v1476_v26 = vor.u32 %v1090_v12, %v954_v16  ;;  %v1478_v27 = vor.u32 %v1091_v17, %v962_v20  ;;  %v1086_v28 = vld [vmem:[%s1647_s1 + $0x4] sm:$0xf] }
  0x26   : > { %361 = vmatpush.bf16.msra.mxu0 %v1392_v55  ;;  %386 = vmatpush.bf16.msra.mxu2 %v1394_v56  ;;  %v960_v29 = vld [vmem:[%s1647_s1 + $0x28] sm:$0xf]  ;;  %v1093_v31 = vld [vmem:[%s1647_s1 + $0x34] sm:$0xf0]  ;;  %v938_v32 = vld [vmem:[%s1647_s1 + $0x10] sm:$0xf0]  ;;  %v1500_v38 = vor.u32 %v1088_v25, %v936_v24 }
  0x27   : > { %374 = vmatpush.bf16.msra.mxu1 %v1404_v59  ;;  %400 = vmatpush.bf16.msra.mxu3 %v1406_v60  ;;  %v1087_v33 = vld [vmem:[%s1647_s1 + $0xc] sm:$0xf]  ;;  %v946_v37 = vld [vmem:[%s1647_s1 + $0x18] sm:$0xf0]  ;;  %v1502_v39 = vor.u32 %v1093_v31, %v960_v29  ;;  %v1506_v40 = vor.u32 %v1086_v28, %v938_v32  ;;  %v944_v42 = vld [vmem:[%s1647_s1 + $0x8] sm:$0xf] }
  0x28   : > { %v1508_v41 = vor.u32 %v1087_v33, %v946_v37  ;;  %v1089_v45 = vld [vmem:[%s1647_s1 + $0x14] sm:$0xf0]  ;;  %v189_v46 = vld [vmem:[#allocation2] sm:$0xf]  ;;  %v192_v58 = vld [vmem:[%s1228_s16 + $0x8] sm:$0xff] }
  0x29   : > { %v1520_v49 = vor.u32 %v1089_v45, %v944_v42  ;;  %v191_v50 = vld [vmem:[%s1228_s16] sm:$0xff]  ;;  %v196_v0 = vunpack.c.h.bf16 %v192_v58  ;;  %v195_v24 = vunpack.c.l.bf16 %v192_v58 }
  0x2a   : > { %362 = vmatpush.bf16.msra.mxu0 %v1428_v3  ;;  %387 = vmatpush.bf16.msra.mxu2 %v1430_v4  ;;  %v193_v51 = vunpack.c.l.bf16 %v191_v50  ;;  %v194_v52 = vunpack.c.h.bf16 %v191_v50 }
  0x2b   : > { %375 = vmatpush.bf16.msra.mxu1 %v1440_v8  ;;  %401 = vmatpush.bf16.msra.mxu3 %v1442_v11 }
  0x2e   : > { %363 = vmatpush.bf16.msra.mxu0 %v1464_v21  ;;  %388 = vmatpush.bf16.msra.mxu2 %v1466_v22 }
  0x2f   : > { %376 = vmatpush.bf16.msra.mxu1 %v1476_v26  ;;  %402 = vmatpush.bf16.msra.mxu3 %v1478_v27 }
  0x32   : > { %364 = vmatpush.bf16.msra.mxu0 %v1500_v38  ;;  %389 = vmatpush.bf16.msra.mxu2 %v1502_v39 }
  0x33   : > { %377 = vmatpush.bf16.msra.mxu1 %v1506_v40  ;;  %403 = vmatpush.bf16.msra.mxu3 %v1508_v41 }
  0x35   : > { %365 = vmatmul.bf16.vlgmr.msra.gmra.mxu0 %v189_v46 }
  0x36   : > { %485 = vmatpush.bf16.msrb.mxu0 %v1244_v5  ;;  %378 = vmatmul.bf16.vlgmr.msra.gmra.mxu1 %v189_v46 }
  0x37   : > { %498 = vmatpush.bf16.msrb.mxu1 %v1255_v9  ;;  %524 = vmatpush.bf16.msrb.mxu3 %v1257_v10 }
  0x38   : > { %404 = vmatmul.bf16.vlgmr.msra.gmra.mxu3 %v189_v46  ;;  %390 = vmatpush.bf16.msra.mxu2 %v1520_v49 }
  0x3a   : > { %486 = vmatpush.bf16.msrb.mxu0 %v1269_v14 }
  0x3b   : > { %499 = vmatpush.bf16.msrb.mxu1 %v1282_v18  ;;  %525 = vmatpush.bf16.msrb.mxu3 %v1284_v19 }
  0x3c   : > { %511 = vmatpush.bf16.msrb.mxu2 %v1295_v23 }
  0x3d   : > { %391 = vmatmul.bf16.vlgmr.msra.gmra.mxu2 %v189_v46 }
  0x3e   : > { %487 = vmatpush.bf16.msrb.mxu0 %v1317_v30 }
  0x3f   : > { %500 = vmatpush.bf16.msrb.mxu1 %v1330_v34  ;;  %526 = vmatpush.bf16.msrb.mxu3 %v1332_v35 }
  0x40   : > { %512 = vmatpush.bf16.msrb.mxu2 %v1334_v36 }
  0x42   : > { %488 = vmatpush.bf16.msrb.mxu0 %v1356_v43 }
  0x43   : > { %501 = vmatpush.bf16.msrb.mxu1 %v1368_v47  ;;  %527 = vmatpush.bf16.msrb.mxu3 %v1370_v48 }
  0x44   : > { %513 = vmatpush.bf16.msrb.mxu2 %v1358_v44 }
  0x46   : > { %489 = vmatpush.bf16.msrb.mxu0 %v1392_v55 }
  0x47   : > { %502 = vmatpush.bf16.msrb.mxu1 %v1404_v59  ;;  %528 = vmatpush.bf16.msrb.mxu3 %v1406_v60 }
  0x48   : > { %514 = vmatpush.bf16.msrb.mxu2 %v1394_v56 }
  0x4a   : > { %490 = vmatpush.bf16.msrb.mxu0 %v1428_v3 }
  0x4b   : > { %503 = vmatpush.bf16.msrb.mxu1 %v1440_v8  ;;  %529 = vmatpush.bf16.msrb.mxu3 %v1442_v11 }
  0x4c   : > { %515 = vmatpush.bf16.msrb.mxu2 %v1430_v4 }
  0x4e   : > { %491 = vmatpush.bf16.msrb.mxu0 %v1464_v21 }
  0x4f   : > { %504 = vmatpush.bf16.msrb.mxu1 %v1476_v26  ;;  %530 = vmatpush.bf16.msrb.mxu3 %v1478_v27 }
  0x50   : > { %516 = vmatpush.bf16.msrb.mxu2 %v1466_v22 }
  0x52   : > { %492 = vmatpush.bf16.msrb.mxu0 %v1500_v38 }
  0x53   : > { %505 = vmatpush.bf16.msrb.mxu1 %v1506_v40  ;;  %531 = vmatpush.bf16.msrb.mxu3 %v1508_v41 }
  0x54   : > { %517 = vmatpush.bf16.msrb.mxu2 %v1502_v39 }
  0x56   : > { %614 = vmatpush.bf16.msra.mxu0 %v1244_v5 }
  0x57   : > { %627 = vmatpush.bf16.msra.mxu1 %v1255_v9  ;;  %653 = vmatpush.bf16.msra.mxu3 %v1257_v10 }
  0x58   : > { %518 = vmatpush.bf16.msrb.mxu2 %v1520_v49 }
  0x5a   : > { %615 = vmatpush.bf16.msra.mxu0 %v1269_v14 }
  0x5b   : > { %628 = vmatpush.bf16.msra.mxu1 %v1282_v18  ;;  %654 = vmatpush.bf16.msra.mxu3 %v1284_v19 }
  0x5c   : > { %640 = vmatpush.bf16.msra.mxu2 %v1295_v23 }
  0x5e   : > { %616 = vmatpush.bf16.msra.mxu0 %v1317_v30 }
  0x5f   : > { %629 = vmatpush.bf16.msra.mxu1 %v1330_v34  ;;  %655 = vmatpush.bf16.msra.mxu3 %v1332_v35 }
  0x60   : > { %641 = vmatpush.bf16.msra.mxu2 %v1334_v36 }
  0x62   : > { %617 = vmatpush.bf16.msra.mxu0 %v1356_v43 }
  0x63   : > { %630 = vmatpush.bf16.msra.mxu1 %v1368_v47  ;;  %656 = vmatpush.bf16.msra.mxu3 %v1370_v48 }
  0x64   : > { %642 = vmatpush.bf16.msra.mxu2 %v1358_v44 }
  0x66   : > { %618 = vmatpush.bf16.msra.mxu0 %v1392_v55 }
  0x67   : > { %631 = vmatpush.bf16.msra.mxu1 %v1404_v59  ;;  %657 = vmatpush.bf16.msra.mxu3 %v1406_v60 }
  0x68   : > { %643 = vmatpush.bf16.msra.mxu2 %v1394_v56 }
  0x6a   : > { %619 = vmatpush.bf16.msra.mxu0 %v1428_v3 }
  0x6b   : > { %632 = vmatpush.bf16.msra.mxu1 %v1440_v8  ;;  %658 = vmatpush.bf16.msra.mxu3 %v1442_v11 }
  0x6c   : > { %644 = vmatpush.bf16.msra.mxu2 %v1430_v4 }
  0x6e   : > { %620 = vmatpush.bf16.msra.mxu0 %v1464_v21 }
  0x6f   : > { %633 = vmatpush.bf16.msra.mxu1 %v1476_v26  ;;  %659 = vmatpush.bf16.msra.mxu3 %v1478_v27 }
  0x70   : > { %645 = vmatpush.bf16.msra.mxu2 %v1466_v22 }
  0x72   : > { %621 = vmatpush.bf16.msra.mxu0 %v1500_v38 }
  0x73   : > { %634 = vmatpush.bf16.msra.mxu1 %v1506_v40  ;;  %660 = vmatpush.bf16.msra.mxu3 %v1508_v41 }
  0x74   : > { %646 = vmatpush.bf16.msra.mxu2 %v1502_v39 }
  0x78   : > { %647 = vmatpush.bf16.msra.mxu2 %v1520_v49 }
  0xb2   : > { %v366_v53 = vpop.f32.mrf.mxu0 }
  0xb3   : > { %v409_v54 = vadd.f32 %v366_v53, %v193_v51  ;;  %v379_v57 = vpop.f32.mrf.mxu1 }
  0xb4   : > { %v410_v61 = vadd.f32 %v379_v57, %v194_v52 }
  0xb5   : > { %v1062_v62 = vmul.f32 -1.442695, %v409_v54 }
  0xb6   : > { %v1063_v63 = vmul.f32 -1.442695, %v410_v61 }
  0xb7   : > { %1128 = vpow2.f32 %v1062_v62 }
  0xb8   : > { %1130 = vpow2.f32 %v1063_v63 }
  0xba   : > { %v368_v6 = vpop.f32.mrf.mxu0 }
  0xbb   : > { %v405_v1 = vpop.f32.mrf.mxu3  ;;  %v381_v7 = vpop.f32.mrf.mxu1 }
  0xbc   : > { %v412_v2 = vadd.f32 %v405_v1, %v196_v0  ;;  %v190_v7 = vld [vmem:[#allocation3] sm:$0xff] }
  0xbd   : > { %v1129_v13 = vpop.eup %1128 }
  0xbe   : > { %v1064_v12 = vmul.f32 -1.442695, %v412_v2  ;;  %v1131_v16 = vpop.eup %1130  ;;  %v416_v17 = vadd.f32 1.0, %v1129_v13 }
  0xbf   : > { %v435_v20 = vadd.f32 1.0, %v1131_v16 }
  0xc0   : > { %v392_v15 = vpop.f32.mrf.mxu2  ;;  %1132 = vpow2.f32 %v1064_v12  ;;  %v428_v51 = vand.u32 2147483648, %v416_v17  ;;  %v426_v54 = vand.u32 2147483647, %v416_v17  ;;  %vm422_vm2 = vweird.f32 %v416_v17 }
  0xc1   : > { %1134 = vrcp.f32 %v416_v17  ;;  %v411_v29 = vadd.f32 %v392_v15, %v195_v24  ;;  %v447_v52 = vand.u32 2147483648, %v435_v20  ;;  %v445_v58 = vand.u32 2147483647, %v435_v20 }
  0xc2   : > { %1136 = vrcp.f32 %v435_v20  ;;  %vm441_vm3 = vweird.f32 %v435_v20  ;;  %v429_v1 = vor.u32 1.1754944e-38, %v428_v51  ;;  %vm427_vm6 = vcmp.eq.f32.partialorder %v426_v54, 8.507059e+37 }
  0xc3   : > { %v407_v25 = vpop.f32.mrf.mxu3  ;;  %v448_v6 = vor.u32 1.1754944e-38, %v447_v52  ;;  %vm446_vm7 = vcmp.eq.f32.partialorder %v445_v58, 8.507059e+37 }
  0xc6   : > { %v1133_v28 = vpop.eup %1132 }
  0xc7   : > { %v455_v31 = vadd.f32 1.0, %v1133_v28  ;;  %v1135_v33 = vpop.eup %1134 }
  0xc8   : > { %v394_v32 = vpop.f32.mrf.mxu2  ;;  %v1137_v37 = vpop.eup %1136  ;;  %v418_v42 = vmul.f32 %v1135_v33, %v416_v17  ;;  %vm423_vm0 = vweird.f32 %v1135_v33 }
  0xc9   : > { %1138 = vrcp.f32 %v455_v31  ;;  %v437_v45 = vmul.f32 %v1137_v37, %v435_v20  ;;  %vm442_vm1 = vweird.f32 %v1137_v37  ;;  %vm424_vm4 = vmor %vm422_vm2, %vm423_vm0  ;;  %v467_v32 = vand.u32 2147483648, %v455_v31 }
  0xca   : > { %1140 = vtanh.f32 %v411_v29  ;;  %v419_v46 = vsub.f32 1.0, %v418_v42  ;;  %vm443_vm5 = vmor %vm441_vm3, %vm442_vm1  ;;  %vm461_vm9 = vweird.f32 %v455_v31  ;;  %v465_v42 = vand.u32 2147483647, %v455_v31 }
  0xcb   : > { %v438_v50 = vsub.f32 1.0, %v437_v45  ;;  %v468_v45 = vor.u32 1.1754944e-38, %v467_v32 }
  0xcc   : > { %v420_v53 = vmul.f32 %v1135_v33, %v419_v46  ;;  %vm466_vm11 = vcmp.eq.f32.partialorder %v465_v42, 8.507059e+37 }
  0xcd   : > { %v439_v57 = vmul.f32 %v1137_v37, %v438_v50 }
  0xce   : > { %v421_v62 = vadd.f32 %v1135_v33, %v420_v53 }
  0xcf   : > { %v1139_v61 = vpop.eup %1138  ;;  %v440_v2 = vadd.f32 %v1137_v37, %v439_v57 }
  0xd0   : > { %v1141_v63 = vpop.eup %1140  ;;  %v457_v0 = vmul.f32 %v1139_v61, %v455_v31  ;;  %v425_v12 = vsel %vm424_vm4, %v1135_v33, %v421_v62  ;;  %vm462_vm8 = vweird.f32 %v1139_v61 }
  0xd1   : > { %v430_v15 = vsel %vm427_vm6, %v429_v1, %v425_v12  ;;  %v444_v16 = vsel %vm443_vm5, %v1137_v37, %v440_v2  ;;  %vm463_vm10 = vmor %vm461_vm9, %vm462_vm8 }
  0xd2   : > { %v458_v13 = vsub.f32 1.0, %v457_v0  ;;  %v449_v24 = vsel %vm446_vm7, %v448_v6, %v444_v16  ;;  %v472_v25 = vmul.f32 %v1141_v63, %v430_v15 }
  0xd3   : > { %v471_v29 = vmul.f32 %v449_v24, %v190_v7 }
  0xd4   : > { %v459_v28 = vmul.f32 %v1139_v61, %v458_v13 }
  0xd5   : > { %v1589_v17 = vadd.f32 %v472_v25, %v471_v29 }
  0xd6   : > { %v460_v20 = vadd.f32 %v1139_v61, %v459_v28 }
  0xd7   : > { %1142 = vtanh.f32 %v1589_v17 }
  0xd8   : > { %v464_v33 = vsel %vm463_vm10, %v1139_v61, %v460_v20 }
  0xd9   : > { %v469_v46 = vsel %vm466_vm11, %v468_v45, %v464_v33 }
  0xdd   : > { %v1143_v37 = vpop.eup %1142 }
  0xde   : > { %v475_v50 = vmul.f32 %v1143_v37, %v469_v46 }
  0xe0   : > { %v476_v51 = vpack.c.bf16 %v475_v50, %v475_v50 }
  0xe2   : > { %477 = vst [vmem:[%s1233_s19] sm:$0xf] %v476_v51  ;;  %493 = vmatmul.bf16.vlgmr.msrb.gmra.mxu0 %v476_v51  ;;  %506 = vmatmul.bf16.vlgmr.msrb.gmra.mxu1 %v476_v51 }
  0xe3   : > { %519 = vmatmul.bf16.vlgmr.msrb.gmra.mxu2 %v476_v51  ;;  %532 = vmatmul.bf16.vlgmr.msrb.gmra.mxu3 %v476_v51 }
  0xe4   : > { %743 = vmatpush.bf16.msrb.mxu0 %v1244_v5  ;;  %756 = vmatpush.bf16.msrb.mxu1 %v1255_v9  ;;  %v1065_v5 = vld [vmem:[%s1228_s16 + $0x10] sm:$0xff] }
  0xe5   : > { %769 = vmatpush.bf16.msrb.mxu2 %v1295_v23  ;;  %782 = vmatpush.bf16.msrb.mxu3 %v1257_v10  ;;  %v481_v9 = vunpack.c.l.bf16 %v1065_v5  ;;  %v482_v10 = vunpack.c.h.bf16 %v1065_v5  ;;  %v1071_v5 = vld [vmem:[%s1228_s16 + $0x20] sm:$0xff] }
  0xe8   : > { %744 = vmatpush.bf16.msrb.mxu0 %v1269_v14  ;;  %757 = vmatpush.bf16.msrb.mxu1 %v1282_v18 }
  0xe9   : > { %770 = vmatpush.bf16.msrb.mxu2 %v1334_v36  ;;  %783 = vmatpush.bf16.msrb.mxu3 %v1284_v19 }
  0xec   : > { %745 = vmatpush.bf16.msrb.mxu0 %v1317_v30  ;;  %758 = vmatpush.bf16.msrb.mxu1 %v1330_v34  ;;  %v1066_v30 = vld [vmem:[%s1228_s16 + $0x18] sm:$0xff] }
  0xed   : > { %771 = vmatpush.bf16.msrb.mxu2 %v1358_v44  ;;  %784 = vmatpush.bf16.msrb.mxu3 %v1332_v35  ;;  %v484_v36 = vunpack.c.h.bf16 %v1066_v30 }
  0xf0   : > { %746 = vmatpush.bf16.msrb.mxu0 %v1356_v43  ;;  %759 = vmatpush.bf16.msrb.mxu1 %v1368_v47 }
  0xf1   : > { %772 = vmatpush.bf16.msrb.mxu2 %v1394_v56  ;;  %785 = vmatpush.bf16.msrb.mxu3 %v1370_v48 }
  0xf4   : > { %747 = vmatpush.bf16.msrb.mxu0 %v1392_v55  ;;  %760 = vmatpush.bf16.msrb.mxu1 %v1404_v59 }
  0xf5   : > { %773 = vmatpush.bf16.msrb.mxu2 %v1430_v4  ;;  %786 = vmatpush.bf16.msrb.mxu3 %v1406_v60 }
  0xf8   : > { %748 = vmatpush.bf16.msrb.mxu0 %v1428_v3  ;;  %761 = vmatpush.bf16.msrb.mxu1 %v1440_v8 }
  0xf9   : > { %774 = vmatpush.bf16.msrb.mxu2 %v1466_v22  ;;  %787 = vmatpush.bf16.msrb.mxu3 %v1442_v11 }
  0xfc   : > { %749 = vmatpush.bf16.msrb.mxu0 %v1464_v21  ;;  %762 = vmatpush.bf16.msrb.mxu1 %v1476_v26  ;;  %v483_v21 = vunpack.c.l.bf16 %v1066_v30  ;;  %v1072_v30 = vld [vmem:[%s1228_s16 + $0x28] sm:$0xff] }
  0xfd   : > { %775 = vmatpush.bf16.msrb.mxu2 %v1502_v39  ;;  %788 = vmatpush.bf16.msrb.mxu3 %v1478_v27 }
 0x100   : > { %750 = vmatpush.bf16.msrb.mxu0 %v1500_v38  ;;  %763 = vmatpush.bf16.msrb.mxu1 %v1506_v40 }
 0x101   : > { %776 = vmatpush.bf16.msrb.mxu2 %v1520_v49  ;;  %789 = vmatpush.bf16.msrb.mxu3 %v1508_v41 }
 0x15f   : > { %v494_v14 = vpop.f32.mrf.mxu0  ;;  %v507_v18 = vpop.f32.mrf.mxu1 }
 0x160   : > { %v537_v19 = vadd.f32 %v494_v14, %v481_v9  ;;  %v538_v23 = vadd.f32 %v507_v18, %v482_v10  ;;  %v610_v9 = vunpack.c.l.bf16 %v1071_v5  ;;  %v611_v10 = vunpack.c.h.bf16 %v1071_v5  ;;  %v1077_v5 = vld [vmem:[%s1228_s16 + $0x30] sm:$0xff] }
 0x162   : > { %v1067_v34 = vmul.f32 -1.442695, %v537_v19  ;;  %v1068_v35 = vmul.f32 -1.442695, %v538_v23 }
 0x164   : > { %1144 = vpow2.f32 %v1067_v34 }
 0x165   : > { %1146 = vpow2.f32 %v1068_v35 }
 0x166   : > { %v520_v43 = vpop.f32.mrf.mxu2  ;;  %v533_v44 = vpop.f32.mrf.mxu3 }
 0x167   : > { %v540_v47 = vadd.f32 %v533_v44, %v484_v36  ;;  %v496_v48 = vpop.f32.mrf.mxu0  ;;  %v509_v55 = vpop.f32.mrf.mxu1  ;;  %v539_v38 = vadd.f32 %v520_v43, %v483_v21  ;;  %v613_v36 = vunpack.c.h.bf16 %v1072_v30  ;;  %v612_v21 = vunpack.c.l.bf16 %v1072_v30  ;;  %v1078_v30 = vld [vmem:[%s1228_s16 + $0x38] sm:$0xff] }
 0x169   : > { %v1069_v56 = vmul.f32 -1.442695, %v540_v47 }
 0x16a   : > { %v1145_v59 = vpop.eup %1144 }
 0x16b   : > { %v1147_v60 = vpop.eup %1146  ;;  %v544_v3 = vadd.f32 1.0, %v1145_v59  ;;  %1148 = vpow2.f32 %v1069_v56 }
 0x16c   : > { %v563_v4 = vadd.f32 1.0, %v1147_v60 }
 0x16d   : > { %1150 = vrcp.f32 %v544_v3  ;;  %v556_v52 = vand.u32 2147483648, %v544_v3  ;;  %v554_v57 = vand.u32 2147483647, %v544_v3  ;;  %vm550_vm14 = vweird.f32 %v544_v3 }
 0x16e   : > { %1152 = vrcp.f32 %v563_v4  ;;  %v522_v8 = vpop.f32.mrf.mxu2  ;;  %v535_v11 = vpop.f32.mrf.mxu3  ;;  %v575_v53 = vand.u32 2147483648, %v563_v4  ;;  %v573_v61 = vand.u32 2147483647, %v563_v4  ;;  %vm569_vm15 = vweird.f32 %v563_v4 }
 0x16f   : > { %v557_v0 = vor.u32 1.1754944e-38, %v556_v52  ;;  %vm555_vm2 = vcmp.eq.f32.partialorder %v554_v57, 8.507059e+37 }
 0x170   : > { %v576_v6 = vor.u32 1.1754944e-38, %v575_v53  ;;  %vm574_vm3 = vcmp.eq.f32.partialorder %v573_v61, 8.507059e+37 }
 0x171   : > { %v1149_v22 = vpop.eup %1148 }
 0x172   : > { %v583_v26 = vadd.f32 1.0, %v1149_v22 }
 0x173   : > { %v1151_v27 = vpop.eup %1150 }
 0x174   : > { %v1153_v39 = vpop.eup %1152  ;;  %v546_v40 = vmul.f32 %v1151_v27, %v544_v3  ;;  %1154 = vrcp.f32 %v583_v26  ;;  %vm551_vm12 = vweird.f32 %v1151_v27  ;;  %v595_v42 = vand.u32 2147483648, %v583_v26 }
 0x175   : > { %v565_v41 = vmul.f32 %v1153_v39, %v563_v4  ;;  %1156 = vtanh.f32 %v539_v38  ;;  %vm570_vm13 = vweird.f32 %v1153_v39  ;;  %vm552_vm0 = vmor %vm550_vm14, %vm551_vm12  ;;  %vm589_vm5 = vweird.f32 %v583_v26 }
 0x176   : > { %v547_v49 = vsub.f32 1.0, %v546_v40  ;;  %vm571_vm1 = vmor %vm569_vm15, %vm570_vm13  ;;  %v593_v33 = vand.u32 2147483647, %v583_v26  ;;  %v596_v37 = vor.u32 1.1754944e-38, %v595_v42 }
 0x177   : > { %v566_v31 = vsub.f32 1.0, %v565_v41 }
 0x178   : > { %v548_v54 = vmul.f32 %v1151_v27, %v547_v49  ;;  %vm594_vm7 = vcmp.eq.f32.partialorder %v593_v33, 8.507059e+37 }
 0x179   : > { %v567_v58 = vmul.f32 %v1153_v39, %v566_v31 }
 0x17a   : > { %v1155_v62 = vpop.eup %1154  ;;  %v549_v63 = vadd.f32 %v1151_v27, %v548_v54 }
 0x17b   : > { %v568_v1 = vadd.f32 %v1153_v39, %v567_v58  ;;  %v585_v2 = vmul.f32 %v1155_v62, %v583_v26  ;;  %v1157_v12 = vpop.eup %1156  ;;  %vm590_vm4 = vweird.f32 %v1155_v62 }
 0x17c   : > { %v553_v7 = vsel %vm552_vm0, %v1151_v27, %v549_v63  ;;  %vm591_vm6 = vmor %vm589_vm5, %vm590_vm4 }
 0x17d   : > { %v558_v13 = vsel %vm555_vm2, %v557_v0, %v553_v7  ;;  %v572_v15 = vsel %vm571_vm1, %v1153_v39, %v568_v1  ;;  %v586_v16 = vsub.f32 1.0, %v585_v2 }
 0x17e   : > { %v577_v24 = vsel %vm574_vm3, %v576_v6, %v572_v15  ;;  %v600_v25 = vmul.f32 %v1157_v12, %v558_v13 }
 0x17f   : > { %v599_v28 = vmul.f32 %v577_v24, %v1589_v17  ;;  %v587_v29 = vmul.f32 %v1155_v62, %v586_v16 }
 0x181   : > { %v1628_v20 = vadd.f32 %v600_v25, %v599_v28  ;;  %v588_v32 = vadd.f32 %v1155_v62, %v587_v29 }
 0x183   : > { %1158 = vtanh.f32 %v1628_v20  ;;  %v592_v45 = vsel %vm591_vm6, %v1155_v62, %v588_v32 }
 0x184   : > { %v597_v50 = vsel %vm594_vm7, %v596_v37, %v592_v45 }
 0x189   : > { %v1159_v46 = vpop.eup %1158 }
 0x18a   : > { %v603_v17 = vmul.f32 %v1159_v46, %v597_v50 }
 0x18c   : > { %v604_v51 = vpack.c.bf16 %v603_v17, %v603_v17 }
 0x18e   : > { %622 = vmatmul.bf16.vlgmr.msra.gmra.mxu0 %v604_v51  ;;  %1070 = vst [vmem:[%s1233_s19 + $0x4] sm:$0xf] %v604_v51  ;;  %635 = vmatmul.bf16.vlgmr.msra.gmra.mxu1 %v604_v51 }
 0x18f   : > { %648 = vmatmul.bf16.vlgmr.msra.gmra.mxu2 %v604_v51  ;;  %661 = vmatmul.bf16.vlgmr.msra.gmra.mxu3 %v604_v51 }
 0x20b   : > { %v623_v14 = vpop.f32.mrf.mxu0  ;;  %v636_v18 = vpop.f32.mrf.mxu1 }
 0x20c   : > { %v666_v19 = vadd.f32 %v623_v14, %v610_v9  ;;  %v667_v23 = vadd.f32 %v636_v18, %v611_v10  ;;  %v739_v9 = vunpack.c.l.bf16 %v1077_v5  ;;  %v740_v10 = vunpack.c.h.bf16 %v1077_v5 }
 0x20e   : > { %v1073_v34 = vmul.f32 -1.442695, %v666_v19  ;;  %v1074_v35 = vmul.f32 -1.442695, %v667_v23 }
 0x210   : > { %1160 = vpow2.f32 %v1073_v34 }
 0x211   : > { %1162 = vpow2.f32 %v1074_v35 }
 0x212   : > { %v649_v43 = vpop.f32.mrf.mxu2  ;;  %v662_v44 = vpop.f32.mrf.mxu3 }
 0x213   : > { %v669_v47 = vadd.f32 %v662_v44, %v613_v36  ;;  %v625_v48 = vpop.f32.mrf.mxu0  ;;  %v638_v55 = vpop.f32.mrf.mxu1  ;;  %v668_v38 = vadd.f32 %v649_v43, %v612_v21  ;;  %v742_v36 = vunpack.c.h.bf16 %v1078_v30  ;;  %v741_v21 = vunpack.c.l.bf16 %v1078_v30 }
 0x215   : > { %v1075_v56 = vmul.f32 -1.442695, %v669_v47 }
 0x216   : > { %v1161_v59 = vpop.eup %1160 }
 0x217   : > { %v1163_v60 = vpop.eup %1162  ;;  %v673_v3 = vadd.f32 1.0, %v1161_v59  ;;  %1164 = vpow2.f32 %v1075_v56 }
 0x218   : > { %v692_v4 = vadd.f32 1.0, %v1163_v60 }
 0x219   : > { %1166 = vrcp.f32 %v673_v3  ;;  %v685_v52 = vand.u32 2147483648, %v673_v3  ;;  %v683_v57 = vand.u32 2147483647, %v673_v3  ;;  %vm679_vm10 = vweird.f32 %v673_v3 }
 0x21a   : > { %1168 = vrcp.f32 %v692_v4  ;;  %v651_v8 = vpop.f32.mrf.mxu2  ;;  %v664_v11 = vpop.f32.mrf.mxu3  ;;  %v704_v53 = vand.u32 2147483648, %v692_v4  ;;  %v702_v61 = vand.u32 2147483647, %v692_v4  ;;  %vm698_vm11 = vweird.f32 %v692_v4 }
 0x21b   : > { %v686_v0 = vor.u32 1.1754944e-38, %v685_v52  ;;  %vm684_vm14 = vcmp.eq.f32.partialorder %v683_v57, 8.507059e+37 }
 0x21c   : > { %v705_v6 = vor.u32 1.1754944e-38, %v704_v53  ;;  %vm703_vm15 = vcmp.eq.f32.partialorder %v702_v61, 8.507059e+37 }
 0x21d   : > { %v1165_v22 = vpop.eup %1164 }
 0x21e   : > { %v712_v26 = vadd.f32 1.0, %v1165_v22 }
 0x21f   : > { %v1167_v27 = vpop.eup %1166 }
 0x220   : > { %v1169_v39 = vpop.eup %1168  ;;  %v675_v40 = vmul.f32 %v1167_v27, %v673_v3  ;;  %1170 = vrcp.f32 %v712_v26  ;;  %vm680_vm8 = vweird.f32 %v1167_v27  ;;  %v724_v33 = vand.u32 2147483648, %v712_v26 }
 0x221   : > { %v694_v41 = vmul.f32 %v1169_v39, %v692_v4  ;;  %1172 = vtanh.f32 %v668_v38  ;;  %vm699_vm9 = vweird.f32 %v1169_v39  ;;  %vm681_vm12 = vmor %vm679_vm10, %vm680_vm8  ;;  %vm718_vm1 = vweird.f32 %v712_v26 }
 0x222   : > { %v676_v49 = vsub.f32 1.0, %v675_v40  ;;  %vm700_vm13 = vmor %vm698_vm11, %vm699_vm9  ;;  %v722_v45 = vand.u32 2147483647, %v712_v26  ;;  %v725_v46 = vor.u32 1.1754944e-38, %v724_v33 }
 0x223   : > { %v695_v31 = vsub.f32 1.0, %v694_v41 }
 0x224   : > { %v677_v54 = vmul.f32 %v1167_v27, %v676_v49  ;;  %vm723_vm3 = vcmp.eq.f32.partialorder %v722_v45, 8.507059e+37 }
 0x225   : > { %v696_v58 = vmul.f32 %v1169_v39, %v695_v31 }
 0x226   : > { %v1171_v62 = vpop.eup %1170  ;;  %v678_v63 = vadd.f32 %v1167_v27, %v677_v54 }
 0x227   : > { %v697_v1 = vadd.f32 %v1169_v39, %v696_v58  ;;  %v714_v2 = vmul.f32 %v1171_v62, %v712_v26  ;;  %v1173_v12 = vpop.eup %1172  ;;  %vm719_vm0 = vweird.f32 %v1171_v62 }
 0x228   : > { %v682_v7 = vsel %vm681_vm12, %v1167_v27, %v678_v63  ;;  %vm720_vm2 = vmor %vm718_vm1, %vm719_vm0 }
 0x229   : > { %v687_v13 = vsel %vm684_vm14, %v686_v0, %v682_v7  ;;  %v701_v15 = vsel %vm700_vm13, %v1169_v39, %v697_v1  ;;  %v715_v16 = vsub.f32 1.0, %v714_v2 }
 0x22a   : > { %v706_v24 = vsel %vm703_vm15, %v705_v6, %v701_v15  ;;  %v729_v25 = vmul.f32 %v1173_v12, %v687_v13 }
 0x22b   : > { %v728_v28 = vmul.f32 %v706_v24, %v1628_v20  ;;  %v716_v29 = vmul.f32 %v1171_v62, %v715_v16 }
 0x22d   : > { %v1635_v32 = vadd.f32 %v729_v25, %v728_v28  ;;  %v717_v42 = vadd.f32 %v1171_v62, %v716_v29 }
 0x22f   : > { %1174 = vtanh.f32 %v1635_v32  ;;  %v721_v37 = vsel %vm720_vm2, %v1171_v62, %v717_v42 }
 0x230   : > { %v726_v17 = vsel %vm723_vm3, %v725_v46, %v721_v37 }
 0x235   : > { %v1175_v50 = vpop.eup %1174 }
 0x236   : > { %v732_v20 = vmul.f32 %v1175_v50, %v726_v17 }
 0x238   : > { %v733_v51 = vpack.c.bf16 %v732_v20, %v732_v20 }
 0x23a   : > { %751 = vmatmul.bf16.vlgmr.msrb.gmra.mxu0 %v733_v51  ;;  %1076 = vst [vmem:[%s1233_s19 + $0x8] sm:$0xf] %v733_v51  ;;  %764 = vmatmul.bf16.vlgmr.msrb.gmra.mxu1 %v733_v51 }
 0x23b   : > { %777 = vmatmul.bf16.vlgmr.msrb.gmra.mxu2 %v733_v51  ;;  %790 = vmatmul.bf16.vlgmr.msrb.gmra.mxu3 %v733_v51 }
 0x2b7   : > { %v752_v14 = vpop.f32.mrf.mxu0  ;;  %v765_v18 = vpop.f32.mrf.mxu1 }
 0x2b8   : > { %v795_v19 = vadd.f32 %v752_v14, %v739_v9  ;;  %v796_v23 = vadd.f32 %v765_v18, %v740_v10 }
 0x2ba   : > { %v1079_v34 = vmul.f32 -1.442695, %v795_v19  ;;  %v1080_v35 = vmul.f32 -1.442695, %v796_v23 }
 0x2bc   : > { %1176 = vpow2.f32 %v1079_v34 }
 0x2bd   : > { %1178 = vpow2.f32 %v1080_v35 }
 0x2be   : > { %v778_v43 = vpop.f32.mrf.mxu2  ;;  %v791_v44 = vpop.f32.mrf.mxu3 }
 0x2bf   : > { %v798_v47 = vadd.f32 %v791_v44, %v742_v36  ;;  %v754_v48 = vpop.f32.mrf.mxu0  ;;  %v767_v55 = vpop.f32.mrf.mxu1  ;;  %v797_v38 = vadd.f32 %v778_v43, %v741_v21 }
 0x2c1   : > { %v1081_v56 = vmul.f32 -1.442695, %v798_v47 }
 0x2c2   : > { %v1177_v59 = vpop.eup %1176 }
 0x2c3   : > { %v1179_v60 = vpop.eup %1178  ;;  %v802_v3 = vadd.f32 1.0, %v1177_v59  ;;  %1180 = vpow2.f32 %v1081_v56 }
 0x2c4   : > { %v821_v4 = vadd.f32 1.0, %v1179_v60 }
 0x2c5   : > { %1182 = vrcp.f32 %v802_v3  ;;  %v814_v52 = vand.u32 2147483648, %v802_v3  ;;  %v812_v57 = vand.u32 2147483647, %v802_v3  ;;  %vm808_vm6 = vweird.f32 %v802_v3 }
 0x2c6   : > { %1184 = vrcp.f32 %v821_v4  ;;  %v780_v8 = vpop.f32.mrf.mxu2  ;;  %v793_v11 = vpop.f32.mrf.mxu3  ;;  %v833_v53 = vand.u32 2147483648, %v821_v4  ;;  %v831_v61 = vand.u32 2147483647, %v821_v4  ;;  %vm827_vm7 = vweird.f32 %v821_v4 }
 0x2c7   : > { %v815_v0 = vor.u32 1.1754944e-38, %v814_v52  ;;  %vm813_vm10 = vcmp.eq.f32.partialorder %v812_v57, 8.507059e+37 }
 0x2c8   : > { %v834_v6 = vor.u32 1.1754944e-38, %v833_v53  ;;  %vm832_vm11 = vcmp.eq.f32.partialorder %v831_v61, 8.507059e+37 }
 0x2c9   : > { %v1181_v22 = vpop.eup %1180 }
 0x2ca   : > { %v841_v26 = vadd.f32 1.0, %v1181_v22 }
 0x2cb   : > { %v1183_v27 = vpop.eup %1182 }
 0x2cc   : > { %v1185_v39 = vpop.eup %1184  ;;  %v804_v40 = vmul.f32 %v1183_v27, %v802_v3  ;;  %1186 = vrcp.f32 %v841_v26  ;;  %vm809_vm4 = vweird.f32 %v1183_v27  ;;  %v853_v45 = vand.u32 2147483648, %v841_v26 }
 0x2cd   : > { %v823_v41 = vmul.f32 %v1185_v39, %v821_v4  ;;  %1188 = vtanh.f32 %v797_v38  ;;  %vm828_vm5 = vweird.f32 %v1185_v39  ;;  %vm810_vm8 = vmor %vm808_vm6, %vm809_vm4  ;;  %vm847_vm13 = vweird.f32 %v841_v26 }
 0x2ce   : > { %v805_v49 = vsub.f32 1.0, %v804_v40  ;;  %vm829_vm9 = vmor %vm827_vm7, %vm828_vm5  ;;  %v851_v37 = vand.u32 2147483647, %v841_v26  ;;  %v854_v50 = vor.u32 1.1754944e-38, %v853_v45 }
 0x2cf   : > { %v824_v31 = vsub.f32 1.0, %v823_v41 }
 0x2d0   : > { %v806_v54 = vmul.f32 %v1183_v27, %v805_v49  ;;  %vm852_vm15 = vcmp.eq.f32.partialorder %v851_v37, 8.507059e+37 }
 0x2d1   : > { %v825_v58 = vmul.f32 %v1185_v39, %v824_v31 }
 0x2d2   : > { %v1187_v62 = vpop.eup %1186  ;;  %v807_v63 = vadd.f32 %v1183_v27, %v806_v54 }
 0x2d3   : > { %v826_v1 = vadd.f32 %v1185_v39, %v825_v58  ;;  %v843_v2 = vmul.f32 %v1187_v62, %v841_v26  ;;  %v1189_v12 = vpop.eup %1188  ;;  %vm848_vm12 = vweird.f32 %v1187_v62 }
 0x2d4   : > { %v811_v7 = vsel %vm810_vm8, %v1183_v27, %v807_v63  ;;  %vm849_vm14 = vmor %vm847_vm13, %vm848_vm12 }
 0x2d5   : > { %v816_v13 = vsel %vm813_vm10, %v815_v0, %v811_v7  ;;  %v830_v15 = vsel %vm829_vm9, %v1185_v39, %v826_v1  ;;  %v844_v16 = vsub.f32 1.0, %v843_v2 }
 0x2d6   : > { %v835_v24 = vsel %vm832_vm11, %v834_v6, %v830_v15  ;;  %v858_v25 = vmul.f32 %v1189_v12, %v816_v13 }
 0x2d7   : > { %v857_v28 = vmul.f32 %v835_v24, %v1635_v32  ;;  %v845_v29 = vmul.f32 %v1187_v62, %v844_v16 }
 0x2d9   : > { %v859_v42 = vadd.f32 %v858_v25, %v857_v28  ;;  %v846_v33 = vadd.f32 %v1187_v62, %v845_v29 }
 0x2db   : > { %1190 = vtanh.f32 %v859_v42  ;;  %866 = vst [vmem:[#allocation3] sm:$0xff] %v859_v42  ;;  %v850_v46 = vsel %vm849_vm14, %v1187_v62, %v846_v33 }
 0x2dc   : > { %v855_v20 = vsel %vm852_vm15, %v854_v50, %v850_v46 }
 0x2e1   : > { %v1191_v17 = vpop.eup %1190 }
 0x2e2   : > { %v861_v51 = vmul.f32 %v1191_v17, %v855_v20 }
 0x2e4   : > { %v862_v5 = vpack.c.bf16 %v861_v51, %v861_v51 }
 0x2e6   : > { %1082 = vst [vmem:[%s1233_s19 + $0xc] sm:$0xf] %v862_v5 }
 0x2e7   : > { %865 = vst [vmem:[#allocation2] sm:$0xf] %v862_v5 }
 0x2e8 PF: > { %s12_s9 = sadd.s32 1, %s1198_s9  }
 0x2e9   : > { %p9_p5 = scmp.ge.s32.totalorder %s12_s9, 4  }
 0x2eb   :  { %11 = sbr.rel (!%p9_p5) target bundleno = 1 (0x1), region = 68 }

// kernel: rnn_lstm_embed_twin_forward.4
= control target key start
LH: loop header
LB: loop body
LE: loop exit
PB: predicated region body
PF: predicated region fallthrough
CT: control target
= control target key end

     0   :  { %vm135_vm0 = vcmask 130048   ;;  %s660_s1 = inlined_call_operand.vmem [shape: bf16[16,512], index: 1, kind: input, shape index: {}]   ;;  %s661_s0 = inlined_call_operand.vmem [shape: bf16[64,16], index: 0, kind: input, shape index: {}]   ;;  %s662_s2 = inlined_call_operand.vmem [shape: f32[1,512], index: 2, kind: input, shape index: {}]   ;;  %s663_s3 = inlined_call_operand.vmem [shape: bf16[64,512], index: 3, kind: output, shape index: {}]  }
   0x1   :  { %v459_v0 = vld [vmem:[%s660_s1] sm:$0xf]  ;;  %v495_v1 = vld [vmem:[%s660_s1 + $0xc] sm:$0xf0]  ;;  %v493_v2 = vld [vmem:[%s660_s1 + $0x4] sm:$0xf] }
   0x2   :  { %v460_v3 = vor.u32 %v495_v1, %v459_v0  ;;  %v461_v4 = vld [vmem:[%s660_s1 + $0x10] sm:$0xf0]  ;;  %v467_v5 = vld [vmem:[%s660_s1 + $0x8] sm:$0xf]  ;;  %v496_v6 = vld [vmem:[%s660_s1 + $0x14] sm:$0xf0] }
   0x3   :  { %v464_v7 = vor.u32 %v493_v2, %v461_v4  ;;  %v468_v8 = vor.u32 %v496_v6, %v467_v5  ;;  %v494_v9 = vld [vmem:[%s660_s1 + $0xc] sm:$0xf]  ;;  %v469_v10 = vld [vmem:[%s660_s1 + $0x18] sm:$0xf0]  ;;  %v489_v11 = vld [vmem:[%s661_s0] sm:$0xff] }
   0x4   :  { %155 = vmatpush.bf16.msra.mxu0 %v460_v3  ;;  %v472_v12 = vor.u32 %v494_v9, %v469_v10  ;;  %v490_v13 = vld [vmem:[%s661_s0 + $0x8] sm:$0xff]  ;;  %v491_v14 = vld [vmem:[%s661_s0 + $0x10] sm:$0xff]  ;;  %v492_v15 = vld [vmem:[%s661_s0 + $0x18] sm:$0xff] }
   0x5   :  { %184 = vmatpush.bf16.msra.mxu1 %v464_v7  ;;  %213 = vmatpush.bf16.msra.mxu2 %v468_v8  ;;  %v363_v16 = vld [vmem:[%s662_s2] sm:$0xf] }
   0x6   :  { %242 = vmatpush.bf16.msra.mxu3 %v472_v12  ;;  %v572_v17 = vperm.slane %v363_v16, 0  ;;  %v574_v18 = vperm.slane %v363_v16, 1  ;;  %v578_v24 = vperm.slane %v363_v16, 2  ;;  %v580_v25 = vperm.slane %v363_v16, 3 }
   0x7   :  { %473 = vmatmul.msk.bf16.vlgmr.msra.gmra.mxu0 %vm135_vm0, %v489_v11 }
   0x8   :  { %477 = vmatmul.msk.bf16.vlgmr.msra.gmra.mxu1 %vm135_vm0, %v489_v11  ;;  %481 = vmatmul.msk.bf16.vlgmr.msra.gmra.mxu2 %vm135_vm0, %v489_v11 }
   0x9   :  { %485 = vmatmul.msk.bf16.vlgmr.msra.gmra.mxu3 %vm135_vm0, %v489_v11 }
  0x17   :  { %474 = vmatmul.msk.bf16.gmra.mxu0 %vm135_vm0, %v490_v13 }
  0x18   :  { %478 = vmatmul.msk.bf16.gmra.mxu1 %vm135_vm0, %v490_v13  ;;  %482 = vmatmul.msk.bf16.gmra.mxu2 %vm135_vm0, %v490_v13 }
  0x19   :  { %486 = vmatmul.msk.bf16.gmra.mxu3 %vm135_vm0, %v490_v13 }
  0x27   :  { %475 = vmatmul.msk.bf16.gmra.mxu0 %vm135_vm0, %v491_v14 }
  0x28   :  { %479 = vmatmul.msk.bf16.gmra.mxu1 %vm135_vm0, %v491_v14  ;;  %483 = vmatmul.msk.bf16.gmra.mxu2 %vm135_vm0, %v491_v14 }
  0x29   :  { %487 = vmatmul.msk.bf16.gmra.mxu3 %vm135_vm0, %v491_v14 }
  0x37   :  { %476 = vmatmul.msk.bf16.gmra.mxu0 %vm135_vm0, %v492_v15 }
  0x38   :  { %480 = vmatmul.msk.bf16.gmra.mxu1 %vm135_vm0, %v492_v15  ;;  %484 = vmatmul.msk.bf16.gmra.mxu2 %vm135_vm0, %v492_v15 }
  0x39   :  { %488 = vmatmul.msk.bf16.gmra.mxu3 %vm135_vm0, %v492_v15 }
  0x84   :  { %v157_v19 = vpop.f32.mrf.mxu0 }
  0x85   :  { %v373_v20 = vadd.f32 %v572_v17, %v157_v19  ;;  %v186_v21 = vpop.f32.mrf.mxu1 }
  0x86   :  { %v374_v22 = vadd.f32 %v574_v18, %v186_v21 }
  0x88   :  { %v405_v23 = vpack.c.bf16 %v374_v22, %v373_v20 }
  0x8a   :  { %421 = vst [vmem:[%s663_s3] sm:$0xff] %v405_v23 }
  0x8b   :  { %v215_v26 = vpop.f32.mrf.mxu2 }
  0x8c   :  { %v375_v27 = vadd.f32 %v578_v24, %v215_v26  ;;  %v244_v28 = vpop.f32.mrf.mxu3  ;;  %v159_v29 = vpop.f32.mrf.mxu0 }
  0x8d   :  { %v376_v30 = vadd.f32 %v580_v25, %v244_v28  ;;  %v377_v31 = vadd.f32 %v572_v17, %v159_v29  ;;  %v188_v32 = vpop.f32.mrf.mxu1 }
  0x8e   :  { %v378_v33 = vadd.f32 %v574_v18, %v188_v32 }
  0x8f   :  { %v406_v34 = vpack.c.bf16 %v376_v30, %v375_v27 }
  0x90   :  { %v407_v35 = vpack.c.bf16 %v378_v33, %v377_v31 }
  0x91   :  { %422 = vst [vmem:[%s663_s3 + $0x8] sm:$0xff] %v406_v34 }
  0x92   :  { %423 = vst [vmem:[%s663_s3 + $0x10] sm:$0xff] %v407_v35 }
  0x93   :  { %v217_v36 = vpop.f32.mrf.mxu2 }
  0x94   :  { %v379_v37 = vadd.f32 %v578_v24, %v217_v36  ;;  %v246_v38 = vpop.f32.mrf.mxu3  ;;  %v162_v39 = vpop.f32.mrf.mxu0 }
  0x95   :  { %v380_v40 = vadd.f32 %v580_v25, %v246_v38  ;;  %v381_v41 = vadd.f32 %v572_v17, %v162_v39  ;;  %v191_v42 = vpop.f32.mrf.mxu1 }
  0x96   :  { %v382_v43 = vadd.f32 %v574_v18, %v191_v42 }
  0x97   :  { %v408_v44 = vpack.c.bf16 %v380_v40, %v379_v37 }
  0x98   :  { %v409_v45 = vpack.c.bf16 %v382_v43, %v381_v41 }
  0x99   :  { %424 = vst [vmem:[%s663_s3 + $0x18] sm:$0xff] %v408_v44 }
  0x9a   :  { %425 = vst [vmem:[%s663_s3 + $0x20] sm:$0xff] %v409_v45 }
  0x9b   :  { %v220_v46 = vpop.f32.mrf.mxu2 }
  0x9c   :  { %v383_v47 = vadd.f32 %v578_v24, %v220_v46  ;;  %v249_v48 = vpop.f32.mrf.mxu3  ;;  %v164_v49 = vpop.f32.mrf.mxu0 }
  0x9d   :  { %v384_v50 = vadd.f32 %v580_v25, %v249_v48  ;;  %v385_v51 = vadd.f32 %v572_v17, %v164_v49  ;;  %v193_v52 = vpop.f32.mrf.mxu1 }
  0x9e   :  { %v386_v53 = vadd.f32 %v574_v18, %v193_v52 }
  0x9f   :  { %v410_v54 = vpack.c.bf16 %v384_v50, %v383_v47 }
  0xa0   :  { %v411_v55 = vpack.c.bf16 %v386_v53, %v385_v51 }
  0xa1   :  { %426 = vst [vmem:[%s663_s3 + $0x28] sm:$0xff] %v410_v54 }
  0xa2   :  { %427 = vst [vmem:[%s663_s3 + $0x30] sm:$0xff] %v411_v55 }
  0xa3   :  { %v222_v56 = vpop.f32.mrf.mxu2 }
  0xa4   :  { %v387_v57 = vadd.f32 %v578_v24, %v222_v56  ;;  %v251_v58 = vpop.f32.mrf.mxu3  ;;  %v167_v59 = vpop.f32.mrf.mxu0 }
  0xa5   :  { %v388_v60 = vadd.f32 %v580_v25, %v251_v58  ;;  %v389_v61 = vadd.f32 %v572_v17, %v167_v59  ;;  %v196_v62 = vpop.f32.mrf.mxu1 }
  0xa6   :  { %v390_v63 = vadd.f32 %v574_v18, %v196_v62 }
  0xa7   :  { %v412_v0 = vpack.c.bf16 %v388_v60, %v387_v57 }
  0xa8   :  { %v413_v1 = vpack.c.bf16 %v390_v63, %v389_v61 }
  0xa9   :  { %428 = vst [vmem:[%s663_s3 + $0x38] sm:$0xff] %v412_v0 }
  0xaa   :  { %429 = vst [vmem:[%s663_s3 + $0x40] sm:$0xff] %v413_v1 }
  0xab   :  { %v225_v2 = vpop.f32.mrf.mxu2 }
  0xac   :  { %v391_v3 = vadd.f32 %v578_v24, %v225_v2  ;;  %v254_v4 = vpop.f32.mrf.mxu3  ;;  %v169_v5 = vpop.f32.mrf.mxu0 }
  0xad   :  { %v392_v6 = vadd.f32 %v580_v25, %v254_v4  ;;  %v393_v7 = vadd.f32 %v572_v17, %v169_v5  ;;  %v198_v8 = vpop.f32.mrf.mxu1 }
  0xae   :  { %v394_v9 = vadd.f32 %v574_v18, %v198_v8 }
  0xaf   :  { %v414_v10 = vpack.c.bf16 %v392_v6, %v391_v3 }
  0xb0   :  { %v415_v11 = vpack.c.bf16 %v394_v9, %v393_v7 }
  0xb1   :  { %430 = vst [vmem:[%s663_s3 + $0x48] sm:$0xff] %v414_v10 }
  0xb2   :  { %431 = vst [vmem:[%s663_s3 + $0x50] sm:$0xff] %v415_v11 }
  0xb3   :  { %v227_v12 = vpop.f32.mrf.mxu2 }
  0xb4   :  { %v395_v13 = vadd.f32 %v578_v24, %v227_v12  ;;  %v256_v14 = vpop.f32.mrf.mxu3  ;;  %v172_v15 = vpop.f32.mrf.mxu0 }
  0xb5   :  { %v396_v16 = vadd.f32 %v580_v25, %v256_v14  ;;  %v397_v19 = vadd.f32 %v572_v17, %v172_v15  ;;  %v201_v20 = vpop.f32.mrf.mxu1 }
  0xb6   :  { %v398_v21 = vadd.f32 %v574_v18, %v201_v20 }
  0xb7   :  { %v416_v22 = vpack.c.bf16 %v396_v16, %v395_v13 }
  0xb8   :  { %v417_v23 = vpack.c.bf16 %v398_v21, %v397_v19 }
  0xb9   :  { %432 = vst [vmem:[%s663_s3 + $0x58] sm:$0xff] %v416_v22 }
  0xba   :  { %433 = vst [vmem:[%s663_s3 + $0x60] sm:$0xff] %v417_v23 }
  0xbb   :  { %v230_v26 = vpop.f32.mrf.mxu2 }
  0xbc   :  { %v399_v27 = vadd.f32 %v578_v24, %v230_v26  ;;  %v259_v28 = vpop.f32.mrf.mxu3  ;;  %v174_v29 = vpop.f32.mrf.mxu0 }
  0xbd   :  { %v400_v30 = vadd.f32 %v580_v25, %v259_v28  ;;  %v401_v31 = vadd.f32 %v572_v17, %v174_v29  ;;  %v203_v32 = vpop.f32.mrf.mxu1 }
  0xbe   :  { %v402_v33 = vadd.f32 %v574_v18, %v203_v32 }
  0xbf   :  { %v418_v34 = vpack.c.bf16 %v400_v30, %v399_v27 }
  0xc0   :  { %v419_v35 = vpack.c.bf16 %v402_v33, %v401_v31 }
  0xc1   :  { %434 = vst [vmem:[%s663_s3 + $0x68] sm:$0xff] %v418_v34 }
  0xc2   :  { %435 = vst [vmem:[%s663_s3 + $0x70] sm:$0xff] %v419_v35 }
  0xc3   :  { %v232_v36 = vpop.f32.mrf.mxu2 }
  0xc4   :  { %v403_v37 = vadd.f32 %v578_v24, %v232_v36  ;;  %v261_v38 = vpop.f32.mrf.mxu3 }
  0xc5   :  { %v404_v39 = vadd.f32 %v580_v25, %v261_v38 }
  0xc7   :  { %v420_v17 = vpack.c.bf16 %v404_v39, %v403_v37 }
  0xc9   :  { %436 = vst [vmem:[%s663_s3 + $0x78] sm:$0xff] %v420_v17 }

</bundles_post_ra>
